<compile_context>
chip_gen: v5e
topology: v5e:2x2
jax: 0.10.0
libtpu: 0.0.40
codegen_flags: <defaults>
</compile_context>

<pallas_src>
import functools

import jax
import jax.numpy as jnp
from jax.experimental import pallas as pl
from jax.experimental.pallas import tpu as pltpu

EPS = 1e-5  # nn.LayerNorm default eps


def _round_up(x, m):
    return ((x + m - 1) // m) * m


# ---------------------------------------------------------------------------
# Single fused kernel: embed MLP -> hoisted input projection -> unrolled LSTM
# recurrence -> fused heads -> lane-aligned direct stores.
# ---------------------------------------------------------------------------
def _fused_kernel(x_ref, h0_ref, c0_ref,
                  ew1, eb1, eg1, ebe1, ew2, eb2, eg2, ebe2,   # metabolite_embed
                  wih, whh, bl,                                # LSTM W_ih, W_hh, b
                  hw1, hb1, hw2, hb2,                          # packed heads
                  out_ref,                                     # (Bp, P + 2H) slab
                  xproj_scr,                                   # VMEM (S*Bp, 4H)
                  *, seq_len, batch_pad, hidden_dim, head_pad,
                  copy_off, copy_len):
    S, B, H = seq_len, batch_pad, hidden_dim
    P = head_pad

    def ln(h, g, be):
        mu = jnp.mean(h, axis=-1, keepdims=True)
        var = jnp.mean((h - mu) ** 2, axis=-1, keepdims=True)
        return (h - mu) * jax.lax.rsqrt(var + EPS) * g[...] + be[...]

    # ---- 1) embed MLP over all S*B rows (time-major layout) ---------------
    x = x_ref[...]                                                     # (S*B, F)
    h1 = jnp.dot(x, ew1[...], preferred_element_type=jnp.float32) + eb1[...]
    h1 = jnp.maximum(ln(h1, eg1, ebe1), 0.0)
    h2 = jnp.dot(h1, ew2[...], preferred_element_type=jnp.float32) + eb2[...]
    emb = jnp.maximum(ln(h2, eg2, ebe2), 0.0)                          # (S*B, H)

    # ---- 1b) hoisted LSTM input projection: one big MXU push --------------
    xproj_scr[...] = (jnp.dot(emb, wih[...],
                              preferred_element_type=jnp.float32)
                      + bl[...])                                       # (S*B, 4H)

    # ---- 2) LSTM recurrence, fully unrolled (S small & static) ------------
    w_hh = whh[...]                                                    # (H, 4H)
    h = h0_ref[...]                                                    # (B, H)
    c = c0_ref[...]                                                    # (B, H)
    # gate-selection mask hoisted out of the loop (JAX does not CSE broadcasts)
    col = jax.lax.broadcasted_iota(jnp.int32, (B, 4 * H), 1)
    is_g = (col >= 2 * H) & (col < 3 * H)
    for t in range(S):
        # static, sublane-tile-aligned slice (B is a multiple of 8)
        x_t = xproj_scr[t * B:(t + 1) * B, :]                          # (B, 4H)
        gates = x_t + jnp.dot(h, w_hh, preferred_element_type=jnp.float32)
        # single sigmoid over the whole tile; tanh(g) = 2*sigmoid(2g) - 1
        z = jnp.where(is_g, gates + gates, gates)
        sg = jax.nn.sigmoid(z)
        acts = jnp.where(is_g, sg + sg - 1.0, sg)
        i_a = acts[:, 0:H]
        f_a = acts[:, H:2 * H]
        g_a = acts[:, 2 * H:3 * H]
        o_a = acts[:, 3 * H:4 * H]
        c = f_a * c + i_a * g_a
        h = o_a * jnp.tanh(c)

    # ---- 3) all five heads via two fused matmuls ---------------------------
    hid = jnp.maximum(
        jnp.dot(h, hw1[...], preferred_element_type=jnp.float32) + hb1[...], 0.0)
    head = jnp.dot(hid, hw2[...], preferred_element_type=jnp.float32) + hb2[...]
    # copy-number head: sigmoid(x) * 8 on its columns only
    colh = jax.lax.broadcasted_iota(jnp.int32, head.shape, 1)
    is_copy = (colh >= copy_off) & (colh < copy_off + copy_len)
    head = jnp.where(is_copy, jax.nn.sigmoid(head) * 8.0, head)

    # ---- 4) direct stores (no epilogue lane-domain concat) ------------------
    out_ref[:, 0:P] = head                 # lane-dense 128-wide head slab
    out_ref[:, P:P + H] = h
    out_ref[:, P + H:P + 2 * H] = c


# ---------------------------------------------------------------------------
# Parameter init (xavier-uniform weights / zero biases, LN gamma=1 beta=0,
# like the PyTorch module).  Weights stored [in, out].
# ---------------------------------------------------------------------------
def _xavier(key, fan_in, fan_out):
    bound = (6.0 / (fan_in + fan_out)) ** 0.5
    return jax.random.uniform(key, (fan_in, fan_out), jnp.float32, -bound, bound)


def init_params(key, *, obs_dim, embedding_dim, hidden_dim,
                n_enzymes, n_compartments, max_enzymes):
    H = hidden_dim
    action_dim = max_enzymes * 3
    ks = jax.random.split(key, 14)
    z = lambda *s: jnp.zeros(s, jnp.float32)
    return {
        # metabolite_embed
        'emb_w1': _xavier(ks[0], obs_dim, embedding_dim), 'emb_b1': z(1, embedding_dim),
        'emb_g1': jnp.ones((1, embedding_dim), jnp.float32), 'emb_be1': z(1, embedding_dim),
        'emb_w2': _xavier(ks[1], embedding_dim, H), 'emb_b2': z(1, H),
        'emb_g2': jnp.ones((1, H), jnp.float32), 'emb_be2': z(1, H),
        # lstm (bias = b_ih + b_hh, both zero at init)
        'lstm_wih': _xavier(ks[2], H, 4 * H), 'lstm_whh': _xavier(ks[3], H, 4 * H),
        'lstm_b': z(1, 4 * H),
        # actor / critic heads
        'act_w1': _xavier(ks[4], H, H), 'act_b1': z(1, H),
        'act_w2': _xavier(ks[5], H, action_dim), 'act_b2': z(1, action_dim),
        'crt_w1': _xavier(ks[6], H, H), 'crt_b1': z(1, H),
        'crt_w2': _xavier(ks[7], H, 1), 'crt_b2': z(1, 1),
        # enzyme selector
        'enz_w1': _xavier(ks[8], H, H), 'enz_b1': z(1, H),
        'enz_w2': _xavier(ks[9], H, n_enzymes * max_enzymes),
        'enz_b2': z(1, n_enzymes * max_enzymes),
        # copy-number head
        'cpy_w1': _xavier(ks[10], H, H // 2), 'cpy_b1': z(1, H // 2),
        'cpy_w2': _xavier(ks[11], H // 2, max_enzymes), 'cpy_b2': z(1, max_enzymes),
        # compartment head
        'cmp_w1': _xavier(ks[12], H, H // 2), 'cmp_b1': z(1, H // 2),
        'cmp_w2': _xavier(ks[13], H // 2, n_compartments * max_enzymes),
        'cmp_b2': z(1, n_compartments * max_enzymes),
    }


# ---------------------------------------------------------------------------
# One-time packing of parameters into the fused-kernel operand set.
# ---------------------------------------------------------------------------
def pack_params(p, *, hidden_dim, n_enzymes, n_compartments, max_enzymes):
    H = hidden_dim
    d_act = max_enzymes * 3
    d_enz = n_enzymes * max_enzymes
    d_cpy = max_enzymes
    d_cmp = n_compartments * max_enzymes
    off_act = 0
    off_val = d_act
    off_enz = off_val + 1
    off_cpy = off_enz + d_enz
    off_cmp = off_cpy + d_cpy
    head_dim = off_cmp + d_cmp
    P = _round_up(head_dim, 128)             # lane-dense output slab width

    # fused first-layer head weights: (H, 3H + 2*(H//2))
    hw1 = jnp.concatenate([p['act_w1'], p['crt_w1'], p['enz_w1'],
                           p['cpy_w1'], p['cmp_w1']], axis=1)
    hb1 = jnp.concatenate([p['act_b1'], p['crt_b1'], p['enz_b1'],
                           p['cpy_b1'], p['cmp_b1']], axis=1)
    K2 = hw1.shape[1]

    # block-diagonal second-layer weights -> one (B, P) lane-dense slab
    hw2 = jnp.zeros((K2, P), jnp.float32)
    hw2 = hw2.at[0:H, off_act:off_act + d_act].set(p['act_w2'])
    hw2 = hw2.at[H:2 * H, off_val:off_val + 1].set(p['crt_w2'])
    hw2 = hw2.at[2 * H:3 * H, off_enz:off_enz + d_enz].set(p['enz_w2'])
    hw2 = hw2.at[3 * H:3 * H + H // 2, off_cpy:off_cpy + d_cpy].set(p['cpy_w2'])
    hw2 = hw2.at[3 * H + H // 2:K2, off_cmp:off_cmp + d_cmp].set(p['cmp_w2'])

    hb2 = jnp.zeros((1, P), jnp.float32)
    hb2 = hb2.at[:, off_act:off_act + d_act].set(p['act_b2'])
    hb2 = hb2.at[:, off_val:off_val + 1].set(p['crt_b2'])
    hb2 = hb2.at[:, off_enz:off_enz + d_enz].set(p['enz_b2'])
    hb2 = hb2.at[:, off_cpy:off_cpy + d_cpy].set(p['cpy_b2'])
    hb2 = hb2.at[:, off_cmp:off_cmp + d_cmp].set(p['cmp_b2'])

    packed = {
        'emb_w1': p['emb_w1'], 'emb_b1': p['emb_b1'],
        'emb_g1': p['emb_g1'], 'emb_be1': p['emb_be1'],
        'emb_w2': p['emb_w2'], 'emb_b2': p['emb_b2'],
        'emb_g2': p['emb_g2'], 'emb_be2': p['emb_be2'],
        # kept separate: W_ih feeds the hoisted projection, W_hh the recurrence
        'lstm_wih': p['lstm_wih'], 'lstm_whh': p['lstm_whh'],
        'lstm_b': p['lstm_b'],
        'head_w1': hw1, 'head_b1': hb1, 'head_w2': hw2, 'head_b2': hb2,
    }
    layout = dict(off_act=off_act, off_val=off_val, off_enz=off_enz,
                  off_cpy=off_cpy, off_cmp=off_cmp, head_pad=P)
    return packed, layout


# ---------------------------------------------------------------------------
# Forward pass: one pallas_call, wrapper only does layout plumbing.
# ---------------------------------------------------------------------------
def sink_designer_forward(packed, layout, obs, hidden_state=None, *,
                          hidden_dim, n_enzymes, n_compartments, max_enzymes):
    if obs.ndim == 2:
        obs = obs[:, None, :]
    obs = obs.astype(jnp.float32)
    B, S, F = obs.shape
    H = hidden_dim
    P = layout['head_pad']
    Bp = max(_round_up(B, 8), 8)             # sublane-pad the batch

    # time-major rows, padded to Bp, so each LSTM step reads a tile-aligned
    # [t*Bp, (t+1)*Bp) slab
    x_sbf = jnp.transpose(obs, (1, 0, 2))                      # (S, B, F)
    if Bp != B:
        x_sbf = jnp.pad(x_sbf, ((0, 0), (0, Bp - B), (0, 0)))
    x_tb = x_sbf.reshape(S * Bp, F)

    if hidden_state is None:
        h0 = jnp.zeros((Bp, H), jnp.float32)
        c0 = jnp.zeros((Bp, H), jnp.float32)
    else:
        h0 = hidden_state[0].reshape(B, H).astype(jnp.float32)
        c0 = hidden_state[1].reshape(B, H).astype(jnp.float32)
        if Bp != B:
            h0 = jnp.pad(h0, ((0, Bp - B), (0, 0)))
            c0 = jnp.pad(c0, ((0, Bp - B), (0, 0)))

    kernel = functools.partial(
        _fused_kernel, seq_len=S, batch_pad=Bp, hidden_dim=H, head_pad=P,
        copy_off=layout['off_cpy'], copy_len=max_enzymes)

    operands = (x_tb, h0, c0,
                packed['emb_w1'], packed['emb_b1'], packed['emb_g1'], packed['emb_be1'],
                packed['emb_w2'], packed['emb_b2'], packed['emb_g2'], packed['emb_be2'],
                packed['lstm_wih'], packed['lstm_whh'], packed['lstm_b'],
                packed['head_w1'], packed['head_b1'], packed['head_w2'], packed['head_b2'])

    E = packed['emb_w1'].shape[1]
    K2 = packed['head_w1'].shape[1]
    flops = int(2 * S * Bp * (F * E + E * H)        # embed MLP
                + 2 * S * Bp * H * 4 * H            # hoisted input projection
                + 2 * S * Bp * H * 4 * H            # recurrence h @ W_hh
                + 2 * Bp * (H * K2 + K2 * P))       # fused heads
    transcendentals = int(S * Bp * 5 * H + Bp * P)
    bytes_accessed = int(sum(o.size * o.dtype.itemsize for o in operands)
                         + Bp * (P + 2 * H) * 4)

    vmem_spec = pl.BlockSpec(memory_space=pltpu.MemorySpace.VMEM)
    out = pl.pallas_call(
        kernel,
        out_shape=jax.ShapeDtypeStruct((Bp, P + 2 * H), jnp.float32),
        in_specs=[vmem_spec] * len(operands),
        out_specs=vmem_spec,
        scratch_shapes=[pltpu.VMEM((S * Bp, 4 * H), jnp.float32)],
        cost_estimate=pl.CostEstimate(flops=flops,
                                      transcendentals=transcendentals,
                                      bytes_accessed=bytes_accessed),
    )(*operands)

    off_act, off_val = layout['off_act'], layout['off_val']
    off_enz, off_cpy, off_cmp = layout['off_enz'], layout['off_cpy'], layout['off_cmp']
    action_dim = max_enzymes * 3
    h_last = out[:B, P:P + H]
    c_last = out[:B, P + H:P + 2 * H]
    return {
        'action_logits': out[:B, off_act:off_act + action_dim],
        'value': out[:B, off_val],
        'hidden_state': (h_last[None], c_last[None]),
        'enzyme_logits': out[:B, off_enz:off_enz + n_enzymes * max_enzymes]
                         .reshape(B, max_enzymes, n_enzymes),
        'copy_numbers': out[:B, off_cpy:off_cpy + max_enzymes],
        'compartment_logits': out[:B, off_cmp:off_cmp + n_compartments * max_enzymes]
                              .reshape(B, max_enzymes, n_compartments),
    }


# ---------------------------------------------------------------------------
# Pure-JAX reference (unpacked params) for correctness checking.
# ---------------------------------------------------------------------------
def _ref_forward(params, obs, *, hidden_dim, n_enzymes, n_compartments, max_enzymes):
    if obs.ndim == 2:
        obs = obs[:, None, :]
    obs = obs.astype(jnp.float32)
    B, S, F = obs.shape
    H = hidden_dim

    def ln(h, g, be):
        mu = jnp.mean(h, axis=-1, keepdims=True)
        var = jnp.mean((h - mu) ** 2, axis=-1, keepdims=True)
        return (h - mu) / jnp.sqrt(var + EPS) * g + be

    h = obs.reshape(B * S, F) @ params['emb_w1'] + params['emb_b1']
    h = jnp.maximum(ln(h, params['emb_g1'], params['emb_be1']), 0.0)
    h = h @ params['emb_w2'] + params['emb_b2']
    emb = jnp.maximum(ln(h, params['emb_g2'], params['emb_be2']), 0.0).reshape(B, S, H)

    hh = jnp.zeros((B, H)); cc = jnp.zeros((B, H))
    for t in range(S):
        gates = emb[:, t] @ params['lstm_wih'] + hh @ params['lstm_whh'] + params['lstm_b']
        i, f, g, o = jnp.split(gates, 4, axis=-1)
        cc = jax.nn.sigmoid(f) * cc + jax.nn.sigmoid(i) * jnp.tanh(g)
        hh = jax.nn.sigmoid(o) * jnp.tanh(cc)
    feat = hh

    def mlp(w1, b1, w2, b2):
        return jnp.maximum(feat @ w1 + b1, 0.0) @ w2 + b2

    return {
        'action_logits': mlp(params['act_w1'], params['act_b1'], params['act_w2'], params['act_b2']),
        'value': mlp(params['crt_w1'], params['crt_b1'], params['crt_w2'], params['crt_b2'])[:, 0],
        'hidden_state': (hh[None], cc[None]),
        'enzyme_logits': mlp(params['enz_w1'], params['enz_b1'], params['enz_w2'], params['enz_b2'])
                         .reshape(B, max_enzymes, n_enzymes),
        'copy_numbers': jax.nn.sigmoid(mlp(params['cpy_w1'], params['cpy_b1'],
                                           params['cpy_w2'], params['cpy_b2'])) * 8.0,
        'compartment_logits': mlp(params['cmp_w1'], params['cmp_b1'], params['cmp_w2'], params['cmp_b2'])
                              .reshape(B, max_enzymes, n_compartments),
    }


if __name__ == "__main__":
    # Small shapes consistent with the module's interface.
    B, S = 2, 8
    OBS_DIM, EMB_DIM, HIDDEN = 32, 32, 64
    N_ENZ, N_COMP, MAX_ENZ = 16, 3, 4

    key = jax.random.PRNGKey(0)
    pkey, okey = jax.random.split(key)
    params = init_params(pkey, obs_dim=OBS_DIM, embedding_dim=EMB_DIM,
                         hidden_dim=HIDDEN, n_enzymes=N_ENZ,
                         n_compartments=N_COMP, max_enzymes=MAX_ENZ)
    packed, layout = pack_params(params, hidden_dim=HIDDEN, n_enzymes=N_ENZ,
                                 n_compartments=N_COMP, max_enzymes=MAX_ENZ)
    obs = jax.random.normal(okey, (B, S, OBS_DIM), jnp.float32)

    out = sink_designer_forward(packed, layout, obs, hidden_state=None,
                                hidden_dim=HIDDEN, n_enzymes=N_ENZ,
                                n_compartments=N_COMP, max_enzymes=MAX_ENZ)
    out = jax.block_until_ready(out)

    ref = _ref_forward(params, obs, hidden_dim=HIDDEN, n_enzymes=N_ENZ,
                       n_compartments=N_COMP, max_enzymes=MAX_ENZ)
    for name in ('action_logits', 'value', 'enzyme_logits',
                 'copy_numbers', 'compartment_logits'):
        assert jnp.allclose(out[name], ref[name], atol=1e-4, rtol=1e-4), name
    assert jnp.allclose(out['hidden_state'][0], ref['hidden_state'][0], atol=1e-4, rtol=1e-4)
    assert jnp.allclose(out['hidden_state'][1], ref['hidden_state'][1], atol=1e-4, rtol=1e-4)

    assert out['action_logits'].shape == (B, MAX_ENZ * 3)
    assert out['value'].shape == (B,)
    assert out['hidden_state'][0].shape == (1, B, HIDDEN)
    assert out['hidden_state'][1].shape == (1, B, HIDDEN)
    assert out['enzyme_logits'].shape == (B, MAX_ENZ, N_ENZ)
    assert out['copy_numbers'].shape == (B, MAX_ENZ)
    assert out['compartment_logits'].shape == (B, MAX_ENZ, N_COMP)

    print("KERNEL_OK")
</pallas_src>

<mosaic_0001>
module attributes {stable_mosaic.version = 11 : i64} {
  func.func @_fused_kernel(%arg0: memref<64x32xf32, #tpu.memory_space<vmem>>, %arg1: memref<8x64xf32, #tpu.memory_space<vmem>>, %arg2: memref<8x64xf32, #tpu.memory_space<vmem>>, %arg3: memref<32x32xf32, #tpu.memory_space<vmem>>, %arg4: memref<1x32xf32, #tpu.memory_space<vmem>>, %arg5: memref<1x32xf32, #tpu.memory_space<vmem>>, %arg6: memref<1x32xf32, #tpu.memory_space<vmem>>, %arg7: memref<32x64xf32, #tpu.memory_space<vmem>>, %arg8: memref<1x64xf32, #tpu.memory_space<vmem>>, %arg9: memref<1x64xf32, #tpu.memory_space<vmem>>, %arg10: memref<1x64xf32, #tpu.memory_space<vmem>>, %arg11: memref<64x256xf32, #tpu.memory_space<vmem>>, %arg12: memref<64x256xf32, #tpu.memory_space<vmem>>, %arg13: memref<1x256xf32, #tpu.memory_space<vmem>>, %arg14: memref<64x256xf32, #tpu.memory_space<vmem>>, %arg15: memref<1x256xf32, #tpu.memory_space<vmem>>, %arg16: memref<256x128xf32, #tpu.memory_space<vmem>>, %arg17: memref<1x128xf32, #tpu.memory_space<vmem>>, %arg18: memref<8x256xf32, #tpu.memory_space<vmem>>, %arg19: memref<64x256xf32, #tpu.memory_space<vmem>>) attributes {dimension_semantics = [], scalar_prefetch = 0 : i64, scratch_operands = 1 : i64, tpu.core_type = #tpu.core_type<tc>} {
    %c0 = arith.constant 0 : index
    %c0_0 = arith.constant 0 : index
    %0 = vector.load %arg0[%c0, %c0_0] : memref<64x32xf32, #tpu.memory_space<vmem>>, vector<64x32xf32>
    %c0_1 = arith.constant 0 : index
    %c0_2 = arith.constant 0 : index
    %1 = vector.load %arg3[%c0_1, %c0_2] : memref<32x32xf32, #tpu.memory_space<vmem>>, vector<32x32xf32>
    %cst = arith.constant dense<0.000000e+00> : vector<64x32xf32>
    %2 = tpu.matmul %0, %1, %cst {dimension_numbers = #tpu.dot_dimension_numbers<[1], [0], [0], [1], [0, 0, 1, 1], [], []>} : vector<64x32xf32>, vector<32x32xf32>, vector<64x32xf32> -> vector<64x32xf32>
    %c0_3 = arith.constant 0 : index
    %c0_4 = arith.constant 0 : index
    %3 = vector.load %arg4[%c0_3, %c0_4] : memref<1x32xf32, #tpu.memory_space<vmem>>, vector<1x32xf32>
    %4 = vector.broadcast %3 : vector<1x32xf32> to vector<64x32xf32>
    %5 = arith.addf %2, %4 : vector<64x32xf32>
    %cst_5 = arith.constant dense<0.000000e+00> : vector<64xf32>
    %6 = vector.multi_reduction <add>, %5, %cst_5 [1] : vector<64x32xf32> to vector<64xf32>
    %7 = vector.shape_cast %6 : vector<64xf32> to vector<64x1xf32>
    %cst_6 = arith.constant 3.200000e+01 : f32
    %8 = vector.broadcast %cst_6 : f32 to vector<64x1xf32>
    %9 = arith.divf %7, %8 : vector<64x1xf32>
    %10 = vector.broadcast %9 : vector<64x1xf32> to vector<64x32xf32>
    %11 = arith.subf %5, %10 : vector<64x32xf32>
    %12 = arith.mulf %11, %11 : vector<64x32xf32>
    %cst_7 = arith.constant dense<0.000000e+00> : vector<64xf32>
    %13 = vector.multi_reduction <add>, %12, %cst_7 [1] : vector<64x32xf32> to vector<64xf32>
    %14 = vector.shape_cast %13 : vector<64xf32> to vector<64x1xf32>
    %cst_8 = arith.constant 3.200000e+01 : f32
    %15 = vector.broadcast %cst_8 : f32 to vector<64x1xf32>
    %16 = arith.divf %14, %15 : vector<64x1xf32>
    %17 = vector.broadcast %9 : vector<64x1xf32> to vector<64x32xf32>
    %18 = arith.subf %5, %17 : vector<64x32xf32>
    %cst_9 = arith.constant 9.99999974E-6 : f32
    %19 = vector.broadcast %cst_9 : f32 to vector<64x1xf32>
    %20 = arith.addf %16, %19 : vector<64x1xf32>
    %21 = math.rsqrt %20 : vector<64x1xf32>
    %22 = vector.broadcast %21 : vector<64x1xf32> to vector<64x32xf32>
    %23 = arith.mulf %18, %22 : vector<64x32xf32>
    %c0_10 = arith.constant 0 : index
    %c0_11 = arith.constant 0 : index
    %24 = vector.load %arg5[%c0_10, %c0_11] : memref<1x32xf32, #tpu.memory_space<vmem>>, vector<1x32xf32>
    %25 = vector.broadcast %24 : vector<1x32xf32> to vector<64x32xf32>
    %26 = arith.mulf %23, %25 : vector<64x32xf32>
    %c0_12 = arith.constant 0 : index
    %c0_13 = arith.constant 0 : index
    %27 = vector.load %arg6[%c0_12, %c0_13] : memref<1x32xf32, #tpu.memory_space<vmem>>, vector<1x32xf32>
    %28 = vector.broadcast %27 : vector<1x32xf32> to vector<64x32xf32>
    %29 = arith.addf %26, %28 : vector<64x32xf32>
    %cst_14 = arith.constant 0.000000e+00 : f32
    %30 = vector.broadcast %cst_14 : f32 to vector<64x32xf32>
    %31 = arith.maximumf %29, %30 : vector<64x32xf32>
    %c0_15 = arith.constant 0 : index
    %c0_16 = arith.constant 0 : index
    %32 = vector.load %arg7[%c0_15, %c0_16] : memref<32x64xf32, #tpu.memory_space<vmem>>, vector<32x64xf32>
    %cst_17 = arith.constant dense<0.000000e+00> : vector<64x64xf32>
    %33 = tpu.matmul %31, %32, %cst_17 {dimension_numbers = #tpu.dot_dimension_numbers<[1], [0], [0], [1], [0, 0, 1, 1], [], []>} : vector<64x32xf32>, vector<32x64xf32>, vector<64x64xf32> -> vector<64x64xf32>
    %c0_18 = arith.constant 0 : index
    %c0_19 = arith.constant 0 : index
    %34 = vector.load %arg8[%c0_18, %c0_19] : memref<1x64xf32, #tpu.memory_space<vmem>>, vector<1x64xf32>
    %35 = vector.broadcast %34 : vector<1x64xf32> to vector<64x64xf32>
    %36 = arith.addf %33, %35 : vector<64x64xf32>
    %cst_20 = arith.constant dense<0.000000e+00> : vector<64xf32>
    %37 = vector.multi_reduction <add>, %36, %cst_20 [1] : vector<64x64xf32> to vector<64xf32>
    %38 = vector.shape_cast %37 : vector<64xf32> to vector<64x1xf32>
    %cst_21 = arith.constant 6.400000e+01 : f32
    %39 = vector.broadcast %cst_21 : f32 to vector<64x1xf32>
    %40 = arith.divf %38, %39 : vector<64x1xf32>
    %41 = vector.broadcast %40 : vector<64x1xf32> to vector<64x64xf32>
    %42 = arith.subf %36, %41 : vector<64x64xf32>
    %43 = arith.mulf %42, %42 : vector<64x64xf32>
    %cst_22 = arith.constant dense<0.000000e+00> : vector<64xf32>
    %44 = vector.multi_reduction <add>, %43, %cst_22 [1] : vector<64x64xf32> to vector<64xf32>
    %45 = vector.shape_cast %44 : vector<64xf32> to vector<64x1xf32>
    %cst_23 = arith.constant 6.400000e+01 : f32
    %46 = vector.broadcast %cst_23 : f32 to vector<64x1xf32>
    %47 = arith.divf %45, %46 : vector<64x1xf32>
    %48 = vector.broadcast %40 : vector<64x1xf32> to vector<64x64xf32>
    %49 = arith.subf %36, %48 : vector<64x64xf32>
    %cst_24 = arith.constant 9.99999974E-6 : f32
    %50 = vector.broadcast %cst_24 : f32 to vector<64x1xf32>
    %51 = arith.addf %47, %50 : vector<64x1xf32>
    %52 = math.rsqrt %51 : vector<64x1xf32>
    %53 = vector.broadcast %52 : vector<64x1xf32> to vector<64x64xf32>
    %54 = arith.mulf %49, %53 : vector<64x64xf32>
    %c0_25 = arith.constant 0 : index
    %c0_26 = arith.constant 0 : index
    %55 = vector.load %arg9[%c0_25, %c0_26] : memref<1x64xf32, #tpu.memory_space<vmem>>, vector<1x64xf32>
    %56 = vector.broadcast %55 : vector<1x64xf32> to vector<64x64xf32>
    %57 = arith.mulf %54, %56 : vector<64x64xf32>
    %c0_27 = arith.constant 0 : index
    %c0_28 = arith.constant 0 : index
    %58 = vector.load %arg10[%c0_27, %c0_28] : memref<1x64xf32, #tpu.memory_space<vmem>>, vector<1x64xf32>
    %59 = vector.broadcast %58 : vector<1x64xf32> to vector<64x64xf32>
    %60 = arith.addf %57, %59 : vector<64x64xf32>
    %cst_29 = arith.constant 0.000000e+00 : f32
    %61 = vector.broadcast %cst_29 : f32 to vector<64x64xf32>
    %62 = arith.maximumf %60, %61 : vector<64x64xf32>
    %c0_30 = arith.constant 0 : index
    %c0_31 = arith.constant 0 : index
    %63 = vector.load %arg11[%c0_30, %c0_31] : memref<64x256xf32, #tpu.memory_space<vmem>>, vector<64x256xf32>
    %cst_32 = arith.constant dense<0.000000e+00> : vector<64x256xf32>
    %64 = tpu.matmul %62, %63, %cst_32 {dimension_numbers = #tpu.dot_dimension_numbers<[1], [0], [0], [1], [0, 0, 1, 1], [], []>} : vector<64x64xf32>, vector<64x256xf32>, vector<64x256xf32> -> vector<64x256xf32>
    %c0_33 = arith.constant 0 : index
    %c0_34 = arith.constant 0 : index
    %65 = vector.load %arg13[%c0_33, %c0_34] : memref<1x256xf32, #tpu.memory_space<vmem>>, vector<1x256xf32>
    %66 = vector.broadcast %65 : vector<1x256xf32> to vector<64x256xf32>
    %67 = arith.addf %64, %66 : vector<64x256xf32>
    %c0_35 = arith.constant 0 : index
    %c0_36 = arith.constant 0 : index
    %68 = vector.load %arg19[%c0_35, %c0_36] : memref<64x256xf32, #tpu.memory_space<vmem>>, vector<64x256xf32>
    tpu.vector_store %arg19[%c0_35, %c0_36], %67 {strides = array<i32>} : memref<64x256xf32, #tpu.memory_space<vmem>>, vector<64x256xf32>,
    %c0_37 = arith.constant 0 : index
    %c0_38 = arith.constant 0 : index
    %69 = vector.load %arg12[%c0_37, %c0_38] : memref<64x256xf32, #tpu.memory_space<vmem>>, vector<64x256xf32>
    %c0_39 = arith.constant 0 : index
    %c0_40 = arith.constant 0 : index
    %70 = vector.load %arg1[%c0_39, %c0_40] : memref<8x64xf32, #tpu.memory_space<vmem>>, vector<8x64xf32>
    %c0_41 = arith.constant 0 : index
    %c0_42 = arith.constant 0 : index
    %71 = vector.load %arg2[%c0_41, %c0_42] : memref<8x64xf32, #tpu.memory_space<vmem>>, vector<8x64xf32>
    %72 = tpu.iota {dimensions = array<i32: 1>} : vector<8x256xi32>
    %c128_i32 = arith.constant 128 : i32
    %73 = vector.broadcast %c128_i32 : i32 to vector<8x256xi32>
    %74 = arith.cmpi sge, %72, %73 : vector<8x256xi32>
    %c192_i32 = arith.constant 192 : i32
    %75 = vector.broadcast %c192_i32 : i32 to vector<8x256xi32>
    %76 = arith.cmpi slt, %72, %75 : vector<8x256xi32>
    %77 = arith.andi %74, %76 : vector<8x256xi1>
    %c0_43 = arith.constant 0 : index
    %c0_44 = arith.constant 0 : index
    %78 = vector.load %arg19[%c0_43, %c0_44] : memref<64x256xf32, #tpu.memory_space<vmem>>, vector<8x256xf32>
    %cst_45 = arith.constant dense<0.000000e+00> : vector<8x256xf32>
    %79 = tpu.matmul %70, %69, %cst_45 {dimension_numbers = #tpu.dot_dimension_numbers<[1], [0], [0], [1], [0, 0, 1, 1], [], []>} : vector<8x64xf32>, vector<64x256xf32>, vector<8x256xf32> -> vector<8x256xf32>
    %80 = arith.addf %78, %79 : vector<8x256xf32>
    %81 = arith.addf %80, %80 : vector<8x256xf32>
    %82 = arith.select %77, %81, %80 : vector<8x256xi1>, vector<8x256xf32>
    %83 = arith.negf %82 : vector<8x256xf32>
    %84 = math.exp %83 : vector<8x256xf32>
    %cst_46 = arith.constant 1.000000e+00 : f32
    %85 = vector.broadcast %cst_46 : f32 to vector<8x256xf32>
    %86 = arith.addf %85, %84 : vector<8x256xf32>
    %87 = arith.divf %85, %86 : vector<8x256xf32>
    %88 = arith.addf %87, %87 : vector<8x256xf32>
    %cst_47 = arith.constant 1.000000e+00 : f32
    %89 = vector.broadcast %cst_47 : f32 to vector<8x256xf32>
    %90 = arith.subf %88, %89 : vector<8x256xf32>
    %91 = arith.select %77, %90, %87 : vector<8x256xi1>, vector<8x256xf32>
    %92 = vector.extract_strided_slice %91 {offsets = [0, 0], sizes = [8, 64], strides = [1, 1]} : vector<8x256xf32> to vector<8x64xf32>
    %93 = vector.extract_strided_slice %91 {offsets = [0, 64], sizes = [8, 64], strides = [1, 1]} : vector<8x256xf32> to vector<8x64xf32>
    %94 = vector.extract_strided_slice %91 {offsets = [0, 128], sizes = [8, 64], strides = [1, 1]} : vector<8x256xf32> to vector<8x64xf32>
    %95 = vector.extract_strided_slice %91 {offsets = [0, 192], sizes = [8, 64], strides = [1, 1]} : vector<8x256xf32> to vector<8x64xf32>
    %96 = arith.mulf %93, %71 : vector<8x64xf32>
    %97 = arith.mulf %92, %94 : vector<8x64xf32>
    %98 = arith.addf %96, %97 : vector<8x64xf32>
    %99 = math.tanh %98 : vector<8x64xf32>
    %100 = arith.mulf %95, %99 : vector<8x64xf32>
    %c8 = arith.constant 8 : index
    %c0_48 = arith.constant 0 : index
    %101 = vector.load %arg19[%c8, %c0_48] : memref<64x256xf32, #tpu.memory_space<vmem>>, vector<8x256xf32>
    %cst_49 = arith.constant dense<0.000000e+00> : vector<8x256xf32>
    %102 = tpu.matmul %100, %69, %cst_49 {dimension_numbers = #tpu.dot_dimension_numbers<[1], [0], [0], [1], [0, 0, 1, 1], [], []>} : vector<8x64xf32>, vector<64x256xf32>, vector<8x256xf32> -> vector<8x256xf32>
    %103 = arith.addf %101, %102 : vector<8x256xf32>
    %104 = arith.addf %103, %103 : vector<8x256xf32>
    %105 = arith.select %77, %104, %103 : vector<8x256xi1>, vector<8x256xf32>
    %106 = arith.negf %105 : vector<8x256xf32>
    %107 = math.exp %106 : vector<8x256xf32>
    %cst_50 = arith.constant 1.000000e+00 : f32
    %108 = vector.broadcast %cst_50 : f32 to vector<8x256xf32>
    %109 = arith.addf %108, %107 : vector<8x256xf32>
    %110 = arith.divf %108, %109 : vector<8x256xf32>
    %111 = arith.addf %110, %110 : vector<8x256xf32>
    %cst_51 = arith.constant 1.000000e+00 : f32
    %112 = vector.broadcast %cst_51 : f32 to vector<8x256xf32>
    %113 = arith.subf %111, %112 : vector<8x256xf32>
    %114 = arith.select %77, %113, %110 : vector<8x256xi1>, vector<8x256xf32>
    %115 = vector.extract_strided_slice %114 {offsets = [0, 0], sizes = [8, 64], strides = [1, 1]} : vector<8x256xf32> to vector<8x64xf32>
    %116 = vector.extract_strided_slice %114 {offsets = [0, 64], sizes = [8, 64], strides = [1, 1]} : vector<8x256xf32> to vector<8x64xf32>
    %117 = vector.extract_strided_slice %114 {offsets = [0, 128], sizes = [8, 64], strides = [1, 1]} : vector<8x256xf32> to vector<8x64xf32>
    %118 = vector.extract_strided_slice %114 {offsets = [0, 192], sizes = [8, 64], strides = [1, 1]} : vector<8x256xf32> to vector<8x64xf32>
    %119 = arith.mulf %116, %98 : vector<8x64xf32>
    %120 = arith.mulf %115, %117 : vector<8x64xf32>
    %121 = arith.addf %119, %120 : vector<8x64xf32>
    %122 = math.tanh %121 : vector<8x64xf32>
    %123 = arith.mulf %118, %122 : vector<8x64xf32>
    %c16 = arith.constant 16 : index
    %c0_52 = arith.constant 0 : index
    %124 = vector.load %arg19[%c16, %c0_52] : memref<64x256xf32, #tpu.memory_space<vmem>>, vector<8x256xf32>
    %cst_53 = arith.constant dense<0.000000e+00> : vector<8x256xf32>
    %125 = tpu.matmul %123, %69, %cst_53 {dimension_numbers = #tpu.dot_dimension_numbers<[1], [0], [0], [1], [0, 0, 1, 1], [], []>} : vector<8x64xf32>, vector<64x256xf32>, vector<8x256xf32> -> vector<8x256xf32>
    %126 = arith.addf %124, %125 : vector<8x256xf32>
    %127 = arith.addf %126, %126 : vector<8x256xf32>
    %128 = arith.select %77, %127, %126 : vector<8x256xi1>, vector<8x256xf32>
    %129 = arith.negf %128 : vector<8x256xf32>
    %130 = math.exp %129 : vector<8x256xf32>
    %cst_54 = arith.constant 1.000000e+00 : f32
    %131 = vector.broadcast %cst_54 : f32 to vector<8x256xf32>
    %132 = arith.addf %131, %130 : vector<8x256xf32>
    %133 = arith.divf %131, %132 : vector<8x256xf32>
    %134 = arith.addf %133, %133 : vector<8x256xf32>
    %cst_55 = arith.constant 1.000000e+00 : f32
    %135 = vector.broadcast %cst_55 : f32 to vector<8x256xf32>
    %136 = arith.subf %134, %135 : vector<8x256xf32>
    %137 = arith.select %77, %136, %133 : vector<8x256xi1>, vector<8x256xf32>
    %138 = vector.extract_strided_slice %137 {offsets = [0, 0], sizes = [8, 64], strides = [1, 1]} : vector<8x256xf32> to vector<8x64xf32>
    %139 = vector.extract_strided_slice %137 {offsets = [0, 64], sizes = [8, 64], strides = [1, 1]} : vector<8x256xf32> to vector<8x64xf32>
    %140 = vector.extract_strided_slice %137 {offsets = [0, 128], sizes = [8, 64], strides = [1, 1]} : vector<8x256xf32> to vector<8x64xf32>
    %141 = vector.extract_strided_slice %137 {offsets = [0, 192], sizes = [8, 64], strides = [1, 1]} : vector<8x256xf32> to vector<8x64xf32>
    %142 = arith.mulf %139, %121 : vector<8x64xf32>
    %143 = arith.mulf %138, %140 : vector<8x64xf32>
    %144 = arith.addf %142, %143 : vector<8x64xf32>
    %145 = math.tanh %144 : vector<8x64xf32>
    %146 = arith.mulf %141, %145 : vector<8x64xf32>
    %c24 = arith.constant 24 : index
    %c0_56 = arith.constant 0 : index
    %147 = vector.load %arg19[%c24, %c0_56] : memref<64x256xf32, #tpu.memory_space<vmem>>, vector<8x256xf32>
    %cst_57 = arith.constant dense<0.000000e+00> : vector<8x256xf32>
    %148 = tpu.matmul %146, %69, %cst_57 {dimension_numbers = #tpu.dot_dimension_numbers<[1], [0], [0], [1], [0, 0, 1, 1], [], []>} : vector<8x64xf32>, vector<64x256xf32>, vector<8x256xf32> -> vector<8x256xf32>
    %149 = arith.addf %147, %148 : vector<8x256xf32>
    %150 = arith.addf %149, %149 : vector<8x256xf32>
    %151 = arith.select %77, %150, %149 : vector<8x256xi1>, vector<8x256xf32>
    %152 = arith.negf %151 : vector<8x256xf32>
    %153 = math.exp %152 : vector<8x256xf32>
    %cst_58 = arith.constant 1.000000e+00 : f32
    %154 = vector.broadcast %cst_58 : f32 to vector<8x256xf32>
    %155 = arith.addf %154, %153 : vector<8x256xf32>
    %156 = arith.divf %154, %155 : vector<8x256xf32>
    %157 = arith.addf %156, %156 : vector<8x256xf32>
    %cst_59 = arith.constant 1.000000e+00 : f32
    %158 = vector.broadcast %cst_59 : f32 to vector<8x256xf32>
    %159 = arith.subf %157, %158 : vector<8x256xf32>
    %160 = arith.select %77, %159, %156 : vector<8x256xi1>, vector<8x256xf32>
    %161 = vector.extract_strided_slice %160 {offsets = [0, 0], sizes = [8, 64], strides = [1, 1]} : vector<8x256xf32> to vector<8x64xf32>
    %162 = vector.extract_strided_slice %160 {offsets = [0, 64], sizes = [8, 64], strides = [1, 1]} : vector<8x256xf32> to vector<8x64xf32>
    %163 = vector.extract_strided_slice %160 {offsets = [0, 128], sizes = [8, 64], strides = [1, 1]} : vector<8x256xf32> to vector<8x64xf32>
    %164 = vector.extract_strided_slice %160 {offsets = [0, 192], sizes = [8, 64], strides = [1, 1]} : vector<8x256xf32> to vector<8x64xf32>
    %165 = arith.mulf %162, %144 : vector<8x64xf32>
    %166 = arith.mulf %161, %163 : vector<8x64xf32>
    %167 = arith.addf %165, %166 : vector<8x64xf32>
    %168 = math.tanh %167 : vector<8x64xf32>
    %169 = arith.mulf %164, %168 : vector<8x64xf32>
    %c32 = arith.constant 32 : index
    %c0_60 = arith.constant 0 : index
    %170 = vector.load %arg19[%c32, %c0_60] : memref<64x256xf32, #tpu.memory_space<vmem>>, vector<8x256xf32>
    %cst_61 = arith.constant dense<0.000000e+00> : vector<8x256xf32>
    %171 = tpu.matmul %169, %69, %cst_61 {dimension_numbers = #tpu.dot_dimension_numbers<[1], [0], [0], [1], [0, 0, 1, 1], [], []>} : vector<8x64xf32>, vector<64x256xf32>, vector<8x256xf32> -> vector<8x256xf32>
    %172 = arith.addf %170, %171 : vector<8x256xf32>
    %173 = arith.addf %172, %172 : vector<8x256xf32>
    %174 = arith.select %77, %173, %172 : vector<8x256xi1>, vector<8x256xf32>
    %175 = arith.negf %174 : vector<8x256xf32>
    %176 = math.exp %175 : vector<8x256xf32>
    %cst_62 = arith.constant 1.000000e+00 : f32
    %177 = vector.broadcast %cst_62 : f32 to vector<8x256xf32>
    %178 = arith.addf %177, %176 : vector<8x256xf32>
    %179 = arith.divf %177, %178 : vector<8x256xf32>
    %180 = arith.addf %179, %179 : vector<8x256xf32>
    %cst_63 = arith.constant 1.000000e+00 : f32
    %181 = vector.broadcast %cst_63 : f32 to vector<8x256xf32>
    %182 = arith.subf %180, %181 : vector<8x256xf32>
    %183 = arith.select %77, %182, %179 : vector<8x256xi1>, vector<8x256xf32>
    %184 = vector.extract_strided_slice %183 {offsets = [0, 0], sizes = [8, 64], strides = [1, 1]} : vector<8x256xf32> to vector<8x64xf32>
    %185 = vector.extract_strided_slice %183 {offsets = [0, 64], sizes = [8, 64], strides = [1, 1]} : vector<8x256xf32> to vector<8x64xf32>
    %186 = vector.extract_strided_slice %183 {offsets = [0, 128], sizes = [8, 64], strides = [1, 1]} : vector<8x256xf32> to vector<8x64xf32>
    %187 = vector.extract_strided_slice %183 {offsets = [0, 192], sizes = [8, 64], strides = [1, 1]} : vector<8x256xf32> to vector<8x64xf32>
    %188 = arith.mulf %185, %167 : vector<8x64xf32>
    %189 = arith.mulf %184, %186 : vector<8x64xf32>
    %190 = arith.addf %188, %189 : vector<8x64xf32>
    %191 = math.tanh %190 : vector<8x64xf32>
    %192 = arith.mulf %187, %191 : vector<8x64xf32>
    %c40 = arith.constant 40 : index
    %c0_64 = arith.constant 0 : index
    %193 = vector.load %arg19[%c40, %c0_64] : memref<64x256xf32, #tpu.memory_space<vmem>>, vector<8x256xf32>
    %cst_65 = arith.constant dense<0.000000e+00> : vector<8x256xf32>
    %194 = tpu.matmul %192, %69, %cst_65 {dimension_numbers = #tpu.dot_dimension_numbers<[1], [0], [0], [1], [0, 0, 1, 1], [], []>} : vector<8x64xf32>, vector<64x256xf32>, vector<8x256xf32> -> vector<8x256xf32>
    %195 = arith.addf %193, %194 : vector<8x256xf32>
    %196 = arith.addf %195, %195 : vector<8x256xf32>
    %197 = arith.select %77, %196, %195 : vector<8x256xi1>, vector<8x256xf32>
    %198 = arith.negf %197 : vector<8x256xf32>
    %199 = math.exp %198 : vector<8x256xf32>
    %cst_66 = arith.constant 1.000000e+00 : f32
    %200 = vector.broadcast %cst_66 : f32 to vector<8x256xf32>
    %201 = arith.addf %200, %199 : vector<8x256xf32>
    %202 = arith.divf %200, %201 : vector<8x256xf32>
    %203 = arith.addf %202, %202 : vector<8x256xf32>
    %cst_67 = arith.constant 1.000000e+00 : f32
    %204 = vector.broadcast %cst_67 : f32 to vector<8x256xf32>
    %205 = arith.subf %203, %204 : vector<8x256xf32>
    %206 = arith.select %77, %205, %202 : vector<8x256xi1>, vector<8x256xf32>
    %207 = vector.extract_strided_slice %206 {offsets = [0, 0], sizes = [8, 64], strides = [1, 1]} : vector<8x256xf32> to vector<8x64xf32>
    %208 = vector.extract_strided_slice %206 {offsets = [0, 64], sizes = [8, 64], strides = [1, 1]} : vector<8x256xf32> to vector<8x64xf32>
    %209 = vector.extract_strided_slice %206 {offsets = [0, 128], sizes = [8, 64], strides = [1, 1]} : vector<8x256xf32> to vector<8x64xf32>
    %210 = vector.extract_strided_slice %206 {offsets = [0, 192], sizes = [8, 64], strides = [1, 1]} : vector<8x256xf32> to vector<8x64xf32>
    %211 = arith.mulf %208, %190 : vector<8x64xf32>
    %212 = arith.mulf %207, %209 : vector<8x64xf32>
    %213 = arith.addf %211, %212 : vector<8x64xf32>
    %214 = math.tanh %213 : vector<8x64xf32>
    %215 = arith.mulf %210, %214 : vector<8x64xf32>
    %c48 = arith.constant 48 : index
    %c0_68 = arith.constant 0 : index
    %216 = vector.load %arg19[%c48, %c0_68] : memref<64x256xf32, #tpu.memory_space<vmem>>, vector<8x256xf32>
    %cst_69 = arith.constant dense<0.000000e+00> : vector<8x256xf32>
    %217 = tpu.matmul %215, %69, %cst_69 {dimension_numbers = #tpu.dot_dimension_numbers<[1], [0], [0], [1], [0, 0, 1, 1], [], []>} : vector<8x64xf32>, vector<64x256xf32>, vector<8x256xf32> -> vector<8x256xf32>
    %218 = arith.addf %216, %217 : vector<8x256xf32>
    %219 = arith.addf %218, %218 : vector<8x256xf32>
    %220 = arith.select %77, %219, %218 : vector<8x256xi1>, vector<8x256xf32>
    %221 = arith.negf %220 : vector<8x256xf32>
    %222 = math.exp %221 : vector<8x256xf32>
    %cst_70 = arith.constant 1.000000e+00 : f32
    %223 = vector.broadcast %cst_70 : f32 to vector<8x256xf32>
    %224 = arith.addf %223, %222 : vector<8x256xf32>
    %225 = arith.divf %223, %224 : vector<8x256xf32>
    %226 = arith.addf %225, %225 : vector<8x256xf32>
    %cst_71 = arith.constant 1.000000e+00 : f32
    %227 = vector.broadcast %cst_71 : f32 to vector<8x256xf32>
    %228 = arith.subf %226, %227 : vector<8x256xf32>
    %229 = arith.select %77, %228, %225 : vector<8x256xi1>, vector<8x256xf32>
    %230 = vector.extract_strided_slice %229 {offsets = [0, 0], sizes = [8, 64], strides = [1, 1]} : vector<8x256xf32> to vector<8x64xf32>
    %231 = vector.extract_strided_slice %229 {offsets = [0, 64], sizes = [8, 64], strides = [1, 1]} : vector<8x256xf32> to vector<8x64xf32>
    %232 = vector.extract_strided_slice %229 {offsets = [0, 128], sizes = [8, 64], strides = [1, 1]} : vector<8x256xf32> to vector<8x64xf32>
    %233 = vector.extract_strided_slice %229 {offsets = [0, 192], sizes = [8, 64], strides = [1, 1]} : vector<8x256xf32> to vector<8x64xf32>
    %234 = arith.mulf %231, %213 : vector<8x64xf32>
    %235 = arith.mulf %230, %232 : vector<8x64xf32>
    %236 = arith.addf %234, %235 : vector<8x64xf32>
    %237 = math.tanh %236 : vector<8x64xf32>
    %238 = arith.mulf %233, %237 : vector<8x64xf32>
    %c56 = arith.constant 56 : index
    %c0_72 = arith.constant 0 : index
    %239 = vector.load %arg19[%c56, %c0_72] : memref<64x256xf32, #tpu.memory_space<vmem>>, vector<8x256xf32>
    %cst_73 = arith.constant dense<0.000000e+00> : vector<8x256xf32>
    %240 = tpu.matmul %238, %69, %cst_73 {dimension_numbers = #tpu.dot_dimension_numbers<[1], [0], [0], [1], [0, 0, 1, 1], [], []>} : vector<8x64xf32>, vector<64x256xf32>, vector<8x256xf32> -> vector<8x256xf32>
    %241 = arith.addf %239, %240 : vector<8x256xf32>
    %242 = arith.addf %241, %241 : vector<8x256xf32>
    %243 = arith.select %77, %242, %241 : vector<8x256xi1>, vector<8x256xf32>
    %244 = arith.negf %243 : vector<8x256xf32>
    %245 = math.exp %244 : vector<8x256xf32>
    %cst_74 = arith.constant 1.000000e+00 : f32
    %246 = vector.broadcast %cst_74 : f32 to vector<8x256xf32>
    %247 = arith.addf %246, %245 : vector<8x256xf32>
    %248 = arith.divf %246, %247 : vector<8x256xf32>
    %249 = arith.addf %248, %248 : vector<8x256xf32>
    %cst_75 = arith.constant 1.000000e+00 : f32
    %250 = vector.broadcast %cst_75 : f32 to vector<8x256xf32>
    %251 = arith.subf %249, %250 : vector<8x256xf32>
    %252 = arith.select %77, %251, %248 : vector<8x256xi1>, vector<8x256xf32>
    %253 = vector.extract_strided_slice %252 {offsets = [0, 0], sizes = [8, 64], strides = [1, 1]} : vector<8x256xf32> to vector<8x64xf32>
    %254 = vector.extract_strided_slice %252 {offsets = [0, 64], sizes = [8, 64], strides = [1, 1]} : vector<8x256xf32> to vector<8x64xf32>
    %255 = vector.extract_strided_slice %252 {offsets = [0, 128], sizes = [8, 64], strides = [1, 1]} : vector<8x256xf32> to vector<8x64xf32>
    %256 = vector.extract_strided_slice %252 {offsets = [0, 192], sizes = [8, 64], strides = [1, 1]} : vector<8x256xf32> to vector<8x64xf32>
    %257 = arith.mulf %254, %236 : vector<8x64xf32>
    %258 = arith.mulf %253, %255 : vector<8x64xf32>
    %259 = arith.addf %257, %258 : vector<8x64xf32>
    %260 = math.tanh %259 : vector<8x64xf32>
    %261 = arith.mulf %256, %260 : vector<8x64xf32>
    %c0_76 = arith.constant 0 : index
    %c0_77 = arith.constant 0 : index
    %262 = vector.load %arg14[%c0_76, %c0_77] : memref<64x256xf32, #tpu.memory_space<vmem>>, vector<64x256xf32>
    %cst_78 = arith.constant dense<0.000000e+00> : vector<8x256xf32>
    %263 = tpu.matmul %261, %262, %cst_78 {dimension_numbers = #tpu.dot_dimension_numbers<[1], [0], [0], [1], [0, 0, 1, 1], [], []>} : vector<8x64xf32>, vector<64x256xf32>, vector<8x256xf32> -> vector<8x256xf32>
    %c0_79 = arith.constant 0 : index
    %c0_80 = arith.constant 0 : index
    %264 = vector.load %arg15[%c0_79, %c0_80] : memref<1x256xf32, #tpu.memory_space<vmem>>, vector<1x256xf32>
    %265 = vector.broadcast %264 : vector<1x256xf32> to vector<8x256xf32>
    %266 = arith.addf %263, %265 : vector<8x256xf32>
    %cst_81 = arith.constant 0.000000e+00 : f32
    %267 = vector.broadcast %cst_81 : f32 to vector<8x256xf32>
    %268 = arith.maximumf %266, %267 : vector<8x256xf32>
    %c0_82 = arith.constant 0 : index
    %c0_83 = arith.constant 0 : index
    %269 = vector.load %arg16[%c0_82, %c0_83] : memref<256x128xf32, #tpu.memory_space<vmem>>, vector<256x128xf32>
    %cst_84 = arith.constant dense<0.000000e+00> : vector<8x128xf32>
    %270 = tpu.matmul %268, %269, %cst_84 {dimension_numbers = #tpu.dot_dimension_numbers<[1], [0], [0], [1], [0, 0, 1, 1], [], []>} : vector<8x256xf32>, vector<256x128xf32>, vector<8x128xf32> -> vector<8x128xf32>
    %c0_85 = arith.constant 0 : index
    %c0_86 = arith.constant 0 : index
    %271 = vector.load %arg17[%c0_85, %c0_86] : memref<1x128xf32, #tpu.memory_space<vmem>>, vector<1x128xf32>
    %272 = vector.broadcast %271 : vector<1x128xf32> to vector<8x128xf32>
    %273 = arith.addf %270, %272 : vector<8x128xf32>
    %274 = tpu.iota {dimensions = array<i32: 1>} : vector<8x128xi32>
    %c77_i32 = arith.constant 77 : i32
    %275 = vector.broadcast %c77_i32 : i32 to vector<8x128xi32>
    %276 = arith.cmpi sge, %274, %275 : vector<8x128xi32>
    %c81_i32 = arith.constant 81 : i32
    %277 = vector.broadcast %c81_i32 : i32 to vector<8x128xi32>
    %278 = arith.cmpi slt, %274, %277 : vector<8x128xi32>
    %279 = arith.andi %276, %278 : vector<8x128xi1>
    %280 = arith.negf %273 : vector<8x128xf32>
    %281 = math.exp %280 : vector<8x128xf32>
    %cst_87 = arith.constant 1.000000e+00 : f32
    %282 = vector.broadcast %cst_87 : f32 to vector<8x128xf32>
    %283 = arith.addf %282, %281 : vector<8x128xf32>
    %284 = arith.divf %282, %283 : vector<8x128xf32>
    %cst_88 = arith.constant 8.000000e+00 : f32
    %285 = vector.broadcast %cst_88 : f32 to vector<8x128xf32>
    %286 = arith.mulf %284, %285 : vector<8x128xf32>
    %287 = arith.select %279, %286, %273 : vector<8x128xi1>, vector<8x128xf32>
    %c0_89 = arith.constant 0 : index
    %c0_90 = arith.constant 0 : index
    %288 = vector.load %arg18[%c0_89, %c0_90] : memref<8x256xf32, #tpu.memory_space<vmem>>, vector<8x128xf32>
    tpu.vector_store %arg18[%c0_89, %c0_90], %287 {strides = array<i32>} : memref<8x256xf32, #tpu.memory_space<vmem>>, vector<8x128xf32>,
    %c0_91 = arith.constant 0 : index
    %c128 = arith.constant 128 : index
    %289 = vector.load %arg18[%c0_91, %c128] : memref<8x256xf32, #tpu.memory_space<vmem>>, vector<8x64xf32>
    tpu.vector_store %arg18[%c0_91, %c128], %261 {strides = array<i32>} : memref<8x256xf32, #tpu.memory_space<vmem>>, vector<8x64xf32>,
    %c0_92 = arith.constant 0 : index
    %c192 = arith.constant 192 : index
    %290 = vector.load %arg18[%c0_92, %c192] : memref<8x256xf32, #tpu.memory_space<vmem>>, vector<8x64xf32>
    tpu.vector_store %arg18[%c0_92, %c192], %259 {strides = array<i32>} : memref<8x256xf32, #tpu.memory_space<vmem>>, vector<8x64xf32>,
    return
  }
}

</mosaic_0001>

<bundles_post_ra>
// kernel: tpu_custom_call.1
= control target key start
LH: loop header
LB: loop body
LE: loop exit
PB: predicated region body
PF: predicated region fallthrough
CT: control target
= control target key end

     0   :  { %s3059_s0 = inlined_call_operand.vmem [shape: f32[64,32], index: 0, kind: input, shape index: {}]   ;;  %s3060_s1 = inlined_call_operand.vmem [shape: f32[8,64], index: 1, kind: input, shape index: {}]   ;;  %s3061_s2 = inlined_call_operand.vmem [shape: f32[8,64], index: 2, kind: input, shape index: {}]   ;;  %s3062_s3 = inlined_call_operand.vmem [shape: f32[32,32], index: 3, kind: input, shape index: {}]   ;;  %s3063_s4 = inlined_call_operand.vmem [shape: f32[1,32], index: 4, kind: input, shape index: {}]   ;;  %s3064_s5 = inlined_call_operand.vmem [shape: f32[1,32], index: 5, kind: input, shape index: {}]   ;;  %s3065_s6 = inlined_call_operand.vmem [shape: f32[1,32], index: 6, kind: input, shape index: {}]   ;;  %s3066_s7 = inlined_call_operand.vmem [shape: f32[32,64], index: 7, kind: input, shape index: {}]   ;;  %s3067_s8 = inlined_call_operand.vmem [shape: f32[1,64], index: 8, kind: input, shape index: {}]   ;;  %s3068_s9 = inlined_call_operand.vmem [shape: f32[1,64], index: 9, kind: input, shape index: {}]   ;;  %s3069_s10 = inlined_call_operand.vmem [shape: f32[1,64], index: 10, kind: input, shape index: {}]   ;;  %s3070_s11 = inlined_call_operand.hbm [shape: f32[64,256], index: 11, kind: input, shape index: {}]   ;;  %s3071_s12 = inlined_call_operand.hbm [shape: f32[64,256], index: 12, kind: input, shape index: {}]   ;;  %s3072_s13 = inlined_call_operand.vmem [shape: f32[1,256], index: 13, kind: input, shape index: {}]   ;;  %s3073_s14 = inlined_call_operand.hbm [shape: f32[64,256], index: 14, kind: input, shape index: {}]   ;;  %s3074_s15 = inlined_call_operand.vmem [shape: f32[1,256], index: 15, kind: input, shape index: {}]   ;;  %s3075_s16 = inlined_call_operand.hbm [shape: f32[256,128], index: 16, kind: input, shape index: {}]   ;;  %s3076_s17 = inlined_call_operand.vmem [shape: f32[1,128], index: 17, kind: input, shape index: {}]   ;;  %s3077_s18 = inlined_call_operand.hbm [shape: f32[8,256], index: 18, kind: output, shape index: {}]  }
   0x1   :  { %3079 = sst [smem:[#allocation16_spill]] %s3059_s0 }
   0x2   :  { %3080 = sst [smem:[#allocation17_spill]] %s3060_s1 }
   0x3   :  { %3081 = sst [smem:[#allocation18_spill]] %s3061_s2 }
   0x4   :  { %23 = vsyncpa [#allocation4], 0 }
   0x5   :  { %24 = vsyncpa [#allocation7], 0 }
   0x6   :  { %25 = vsyncpa [#allocation10], 0 }
   0x7   :  { %26 = vsyncpa [#allocation5], 0  ;;  %s66_s29 = sshll.u32 %s3071_s12, 4  ;;  %s2289_s30 = smov [#allocation6]   ;;  %s67_s29 = int_to_ptr.hbm [resolvable:$true] %s66_s29 }
   0x8   :  { %s68_s0 = sshll.u32 %s2289_s30, 4  ;;  %s53_s20 = sshll.u32 %s3070_s11, 4  ;;  %s69_s0 = int_to_ptr.vmem [resolvable:$true] %s68_s0  ;;  %s54_s20 = int_to_ptr.hbm [resolvable:$true] %s53_s20 }
   0x9   :  { %s2290_s21 = smov 256   ;;  %s2291_s22 = smov 16  }
   0xa   :  { %74 = dma.hbm_to_vmem [thread:$0]  %s67_s29, 2048, %s69_s0, [#allocation7], %s2290_s21, %s2290_s21, %s2291_s22  }
   0xb   :  { %s2292_s2 = smov [#allocation3]   ;;  %s81_s26 = sshll.u32 %s3073_s14, 4  ;;  %s82_s26 = int_to_ptr.hbm [resolvable:$true] %s81_s26 }
   0xc   :  { %s55_s23 = sshll.u32 %s2292_s2, 4  ;;  %s96_s28 = sshll.u32 %s3075_s16, 4  ;;  %s56_s23 = int_to_ptr.vmem [resolvable:$true] %s55_s23  ;;  %s97_s28 = int_to_ptr.hbm [resolvable:$true] %s96_s28 }
   0xd   :  { %61 = dma.hbm_to_vmem [thread:$0]  %s54_s20, 2048, %s56_s23, [#allocation4], %s2290_s21, %s2290_s21, %s2291_s22  }
   0xe   :  { %s2293_s30 = smov [#allocation8]   ;;  %s2294_s11 = smov [#allocation9]  }
   0xf   :  { %s83_s19 = sshll.u32 %s2293_s30, 4  ;;  %s98_s29 = sshll.u32 %s2294_s11, 4  ;;  %s84_s19 = int_to_ptr.vmem [resolvable:$true] %s83_s19  ;;  %s99_s29 = int_to_ptr.vmem [resolvable:$true] %s98_s29 }
  0x10   :  { %89 = dma.hbm_to_vmem [thread:$0]  %s82_s26, 2048, %s84_s19, [#allocation7], %s2290_s21, %s2290_s21, %s2291_s22  }
  0x11   :  { %s2295_s0 = smov 128   ;;  %s2296_s1 = smov 8  }
  0x12   :  { %104 = dma.hbm_to_vmem [thread:$0]  %s97_s28, 4096, %s99_s29, [#allocation10], %s2295_s0, %s2295_s0, %s2296_s1  }
  0x13   :  { %2281 = dma.done.wait [#allocation4], 2048  }
  0x14   :  { %2282 = vsyncadd [#allocation4], 4294965248 }
  0x15   :  { %2283 = dma.done.wait [#allocation7], 4096  }
  0x16   :  { %2284 = vsyncadd [#allocation7], 4294963200 }
  0x17   :  { %2285 = dma.done.wait [#allocation10], 4096  }
  0x18   :  { %2286 = vsyncadd [#allocation10], 4294963200  ;;  %v134_v0 = vld [vmem:[%s3062_s3 + $0x18] sm:$0xff]  ;;  %v133_v1 = vld [vmem:[%s3062_s3 + $0x10] sm:$0xff]  ;;  %s3082_s12 = sld [smem:[#allocation16_spill]]  ;;  %vm139_vm0 = vcmask 261120  }
  0x19   :  { %176 = vmatpush.msra.mxu0 %v134_v0  ;;  %v132_v2 = vld [vmem:[%s3062_s3 + $0x8] sm:$0xff]  ;;  %v131_v3 = vld [vmem:[%s3062_s3] sm:$0xff]  ;;  %v2297_v29 = vmov 32.0   ;;  %vm493_vm14 = vcmask 523264   ;;  %s3085_s0 = sld [smem:[#allocation17_spill]]  ;;  %s2299_s21 = smov 64  }
  0x1a   :  { %v2018_v12 = vld [vmem:[%s3063_s4] ss:$0 sm:$0xff]  ;;  %2025 = vrcp.f32 %v2297_v29  ;;  %s3086_s2 = sld [smem:[#allocation18_spill]]  ;;  %s1911_s27 = sshll.u32 %s3077_s18, 4  ;;  %s1912_s27 = int_to_ptr.hbm [resolvable:$true] %s1911_s27 }
  0x1b   :  { %177 = vmatpush.msra.mxu0 %v133_v1 }
  0x1d   :  { %178 = vmatpush.msra.mxu0 %v132_v2 }
  0x1e   :  { %v123_v4 = vld [vmem:[%s3082_s12] sm:$0xff]  ;;  %v124_v5 = vld [vmem:[%s3082_s12 + $0x8] sm:$0xff]  ;;  %v125_v6 = vld [vmem:[%s3082_s12 + $0x10] sm:$0xff] }
  0x1f   :  { %179 = vmatpush.msra.mxu0 %v131_v3  ;;  %v126_v7 = vld [vmem:[%s3082_s12 + $0x18] sm:$0xff]  ;;  %v127_v8 = vld [vmem:[%s3082_s12 + $0x20] sm:$0xff]  ;;  %v128_v9 = vld [vmem:[%s3082_s12 + $0x28] sm:$0xff] }
  0x20   :  { %1923 = vmatmul.msk.f32.vlgmr.msra.gmra.mxu0 %vm139_vm0, %v123_v4  ;;  %v129_v10 = vld [vmem:[%s3082_s12 + $0x30] sm:$0xff]  ;;  %v130_v11 = vld [vmem:[%s3082_s12 + $0x38] sm:$0xff]  ;;  %v2026_v30 = vpop.eup %2025 }
  0x21   :  { %v230_v33 = vmul.f32 32.0, %v2026_v30  ;;  %vm234_vm1 = vweird.f32 %v2026_v30 }
  0x23   :  { %v231_v35 = vsub.f32 1.0, %v230_v33  ;;  %v2527_v33 = vld [vmem:[%s3064_s5] ss:$0 sm:$0xff] }
  0x25   :  { %v232_v36 = vmul.f32 %v2026_v30, %v231_v35 }
  0x27   :  { %v233_v37 = vadd.f32 %v2026_v30, %v232_v36 }
  0x28   :  { %1924 = vmatmul.msk.f32.gmra.mxu0 %vm139_vm0, %v124_v5  ;;  %v423_v5 = vld [vmem:[%s3066_s7 + $0x18] sm:$0xff] }
  0x29   :  { %v2464_v38 = vsel %vm234_vm1, %v2026_v30, %v233_v37  ;;  %464 = vmatpush.msra.mxu1 %v423_v5  ;;  %v2533_v37 = vld [vmem:[%s3065_s6] ss:$0 sm:$0xff] }
  0x30   :  { %1925 = vmatmul.msk.f32.gmra.mxu0 %vm139_vm0, %v125_v6  ;;  %v422_v6 = vld [vmem:[%s3066_s7 + $0x10] sm:$0xff] }
  0x31   :  { %465 = vmatpush.msra.mxu1 %v422_v6 }
  0x38   :  { %1926 = vmatmul.msk.f32.gmra.mxu0 %vm139_vm0, %v126_v7  ;;  %v421_v7 = vld [vmem:[%s3066_s7 + $0x8] sm:$0xff] }
  0x39   :  { %466 = vmatpush.msra.mxu1 %v421_v7 }
  0x40   :  { %1927 = vmatmul.msk.f32.gmra.mxu0 %vm139_vm0, %v127_v8  ;;  %v420_v8 = vld [vmem:[%s3066_s7] sm:$0xff] }
  0x41   :  { %467 = vmatpush.msra.mxu1 %v420_v8 }
  0x48   :  { %1928 = vmatmul.msk.f32.gmra.mxu0 %vm139_vm0, %v128_v9 }
  0x50   :  { %1929 = vmatmul.msk.f32.gmra.mxu0 %vm139_vm0, %v129_v10 }
  0x58   :  { %1930 = vmatmul.msk.f32.gmra.mxu0 %vm139_vm0, %v130_v11 }
  0x9d   :  { %v181_v13 = vpop.f32.mrf.mxu0 }
  0x9e   :  { %v182_v14 = vadd.f32 %v2018_v12, %v181_v13 }
  0xa0   :  { %v205_v15 = vsel %vm139_vm0, %v182_v14, 0.0 }
  0xa1   :  { %206 = vadd.xlane.f32.xlu0 %v205_v15 }
  0xa5   :  { %v184_v16 = vpop.f32.mrf.mxu0 }
  0xa6   :  { %v185_v17 = vadd.f32 %v2018_v12, %v184_v16 }
  0xa8   :  { %v208_v18 = vsel %vm139_vm0, %v185_v17, 0.0 }
  0xa9   :  { %209 = vadd.xlane.f32.xlu1 %v208_v18 }
  0xad   :  { %v187_v19 = vpop.f32.mrf.mxu0 }
  0xae   :  { %v188_v20 = vadd.f32 %v2018_v12, %v187_v19 }
  0xb0   :  { %v211_v21 = vsel %vm139_vm0, %v188_v20, 0.0 }
  0xb1   :  { %212 = vadd.xlane.f32.xlu1 %v211_v21 }
  0xb5   :  { %v190_v22 = vpop.f32.mrf.mxu0 }
  0xb6   :  { %v191_v23 = vadd.f32 %v2018_v12, %v190_v22 }
  0xb8   :  { %v214_v24 = vsel %vm139_vm0, %v191_v23, 0.0 }
  0xb9   :  { %215 = vadd.xlane.f32.xlu2 %v214_v24 }
  0xbd   :  { %v193_v25 = vpop.f32.mrf.mxu0 }
  0xbe   :  { %v2459_v26 = vadd.f32 %v2018_v12, %v193_v25 }
  0xc0   :  { %v217_v28 = vsel %vm139_vm0, %v2459_v26, 0.0 }
  0xc1   :  { %218 = vadd.xlane.f32.xlu2 %v217_v28 }
  0xc5   :  { %v196_v27 = vpop.f32.mrf.mxu0 }
  0xc6   :  { %v197_v45 = vadd.f32 %v2018_v12, %v196_v27 }
  0xc8   :  { %v220_v49 = vsel %vm139_vm0, %v197_v45, 0.0 }
  0xcd   :  { %v199_v31 = vpop.f32.mrf.mxu0 }
  0xce   :  { %v200_v32 = vadd.f32 %v2018_v12, %v199_v31 }
  0xd0   :  { %v223_v34 = vsel %vm139_vm0, %v200_v32, 0.0 }
  0xd1   :  { %224 = vadd.xlane.f32.xlu1 %v223_v34 }
  0xd5   :  { %v202_v50 = vpop.f32.mrf.mxu0 }
  0xd6   :  { %v2480_v54 = vadd.f32 %v2018_v12, %v202_v50 }
  0xd8   :  { %v226_v57 = vsel %vm139_vm0, %v2480_v54, 0.0 }
 0x114   :  { %v207_v39 = vpop.xlane.xlu0 %206 }
 0x115   :  { %v236_v40 = vmul.f32 %v2464_v38, %v207_v39 }
 0x117   :  { %v2467_v41 = vsub.f32 %v182_v14, %v236_v40 }
 0x119   :  { %v252_v42 = vmul.f32 %v2467_v41, %v2467_v41 }
 0x11b   :  { %v260_v43 = vsel %vm139_vm0, %v252_v42, 0.0 }
 0x11c   :  { %v210_v44 = vpop.xlane.xlu1 %209  ;;  %261 = vadd.xlane.f32.xlu0 %v260_v43 }
 0x11d   :  { %v237_v46 = vmul.f32 %v2464_v38, %v210_v44 }
 0x11f   :  { %v2473_v47 = vsub.f32 %v185_v17, %v237_v46 }
 0x121   :  { %v253_v48 = vmul.f32 %v2473_v47, %v2473_v47 }
 0x123   :  { %v263_v51 = vsel %vm139_vm0, %v253_v48, 0.0 }
 0x124   :  { %264 = vadd.xlane.f32.xlu2 %v263_v51  ;;  %221 = vadd.xlane.f32.xlu0 %v220_v49  ;;  %v213_v52 = vpop.xlane.xlu1 %212 }
 0x125   :  { %v238_v53 = vmul.f32 %v2464_v38, %v213_v52 }
 0x127   :  { %v2482_v55 = vsub.f32 %v188_v20, %v238_v53 }
 0x129   :  { %v254_v56 = vmul.f32 %v2482_v55, %v2482_v55 }
 0x12b   :  { %v266_v58 = vsel %vm139_vm0, %v254_v56, 0.0 }
 0x12c   :  { %v216_v59 = vpop.xlane.xlu2 %215  ;;  %267 = vadd.xlane.f32.xlu2 %v266_v58  ;;  %227 = vadd.xlane.f32.xlu0 %v226_v57 }
 0x12d   :  { %v239_v60 = vmul.f32 %v2464_v38, %v216_v59 }
 0x12f   :  { %v2490_v61 = vsub.f32 %v191_v23, %v239_v60 }
 0x131   :  { %v255_v62 = vmul.f32 %v2490_v61, %v2490_v61 }
 0x133   :  { %v269_v63 = vsel %vm139_vm0, %v255_v62, 0.0 }
 0x134   :  { %270 = vadd.xlane.f32.xlu0 %v269_v63  ;;  %v2513_v9 = vpop.xlane.xlu2 %218 }
 0x144   :  { %v225_v0 = vpop.xlane.xlu1 %224 }
 0x145   :  { %v242_v1 = vmul.f32 %v2464_v38, %v225_v0 }
 0x147   :  { %v2496_v2 = vsub.f32 %v200_v32, %v242_v1 }
 0x149   :  { %v258_v3 = vmul.f32 %v2496_v2, %v2496_v2 }
 0x14b   :  { %v278_v4 = vsel %vm139_vm0, %v258_v3, 0.0 }
 0x14c   :  { %279 = vadd.xlane.f32.xlu0 %v278_v4 }
 0x18f   :  { %v262_v10 = vpop.xlane.xlu0 %261 }
 0x190   :  { %v284_v11 = vmul.f32 %v262_v10, %v2464_v38 }
 0x192   :  { %v292_v12 = vadd.f32 1e-05, %v284_v11 }
 0x194   :  { %2027 = vrsqrt.f32 %v292_v12  ;;  %vm306_vm3 = vweird.f32 %v292_v12 }
 0x197   :  { %v265_v13 = vpop.xlane.xlu2 %264  ;;  %v222_v14 = vpop.xlane.xlu0 %221 }
 0x198   :  { %v285_v15 = vmul.f32 %v265_v13, %v2464_v38  ;;  %v241_v16 = vmul.f32 %v2464_v38, %v222_v14 }
 0x19a   :  { %v2028_v17 = vpop.eup %2027  ;;  %v293_v18 = vadd.f32 1e-05, %v285_v15  ;;  %v2518_v19 = vsub.f32 %v197_v45, %v241_v16  ;;  %v2554_v16 = vld [vmem:[%s3067_s8] ss:$0 sm:$0xff] }
 0x19b   :  { %v301_v20 = vmul.f32 %v2028_v17, %v292_v12  ;;  %vm307_vm2 = vweird.f32 %v2028_v17 }
 0x19c   :  { %2029 = vrsqrt.f32 %v293_v18  ;;  %v257_v21 = vmul.f32 %v2518_v19, %v2518_v19  ;;  %vm308_vm4 = vmor %vm306_vm3, %vm307_vm2  ;;  %vm316_vm5 = vweird.f32 %v293_v18 }
 0x19d   :  { %v302_v22 = vmul.f32 %v2028_v17, %v301_v20 }
 0x19e   :  { %v275_v23 = vsel %vm139_vm0, %v257_v21, 0.0 }
 0x19f   :  { %v303_v24 = vmul.f32 0.5, %v302_v22  ;;  %276 = vadd.xlane.f32.xlu2 %v275_v23  ;;  %v268_v25 = vpop.xlane.xlu2 %267  ;;  %v228_v63 = vpop.xlane.xlu0 %227 }
 0x1a0   :  { %v286_v27 = vmul.f32 %v268_v25, %v2464_v38  ;;  %v243_v22 = vmul.f32 %v2464_v38, %v228_v63 }
 0x1a1   :  { %v304_v28 = vsub.f32 1.5, %v303_v24 }
 0x1a2   :  { %v2030_v29 = vpop.eup %2029  ;;  %v294_v30 = vadd.f32 1e-05, %v286_v27 }
 0x1a3   :  { %v305_v31 = vmul.f32 %v2028_v17, %v304_v28  ;;  %v311_v32 = vmul.f32 %v2030_v29, %v293_v18  ;;  %vm317_vm6 = vweird.f32 %v2030_v29 }
 0x1a4   :  { %2031 = vrsqrt.f32 %v294_v30  ;;  %vm318_vm7 = vmor %vm316_vm5, %vm317_vm6  ;;  %vm326_vm8 = vweird.f32 %v294_v30 }
 0x1a5   :  { %v309_v34 = vsel %vm308_vm4, %v2028_v17, %v305_v31  ;;  %v312_v35 = vmul.f32 %v2030_v29, %v311_v32  ;;  %v240_v17 = vmul.f32 %v2464_v38, %v2513_v9  ;;  %v2568_v9 = vsub.f32 %v2480_v54, %v243_v22 }
 0x1a6   :  { %v380_v36 = vmul.f32 %v309_v34, %v2467_v41 }
 0x1a7   :  { %v313_v39 = vmul.f32 0.5, %v312_v35  ;;  %v271_v1 = vpop.xlane.xlu0 %270 }
 0x1a8   :  { %v392_v40 = vmul.f32 %v2527_v33, %v380_v36  ;;  %v287_v3 = vmul.f32 %v271_v1, %v2464_v38 }
 0x1a9   :  { %v314_v42 = vsub.f32 1.5, %v313_v39 }
 0x1aa   :  { %v2032_v43 = vpop.eup %2031  ;;  %v404_v44 = vadd.f32 %v2533_v37, %v392_v40  ;;  %v295_v4 = vadd.f32 1e-05, %v287_v3 }
 0x1ab   :  { %v315_v45 = vmul.f32 %v2030_v29, %v314_v42  ;;  %v321_v46 = vmul.f32 %v2032_v43, %v294_v30  ;;  %vm327_vm9 = vweird.f32 %v2032_v43  ;;  %v2298_v30 = vmov 64.0  }
 0x1ac   :  { %v412_v48 = vmax.f32 %v404_v44, 0.0  ;;  %vm328_vm10 = vmor %vm326_vm8, %vm327_vm9  ;;  %2033 = vrsqrt.f32 %v295_v4  ;;  %vm336_vm11 = vweird.f32 %v295_v4 }
 0x1ad   :  { %v319_v49 = vsel %vm318_vm7, %v2030_v29, %v315_v45  ;;  %v322_v41 = vmul.f32 %v2032_v43, %v321_v46  ;;  %2035 = vrcp.f32 %v2298_v30 }
 0x1ae   :  { %1931 = vmatmul.msk.f32.vlgmr.msra.gmra.mxu1 %vm139_vm0, %v412_v48  ;;  %v381_v50 = vmul.f32 %v319_v49, %v2473_v47 }
 0x1af   :  { %v323_v51 = vmul.f32 0.5, %v322_v41 }
 0x1b0   :  { %v393_v52 = vmul.f32 %v2527_v33, %v381_v50 }
 0x1b1   :  { %v324_v53 = vsub.f32 1.5, %v323_v51 }
 0x1b2   :  { %v405_v56 = vadd.f32 %v2533_v37, %v393_v52  ;;  %v2034_v5 = vpop.eup %2033 }
 0x1b3   :  { %v325_v57 = vmul.f32 %v2032_v43, %v324_v53  ;;  %v331_v6 = vmul.f32 %v2034_v5, %v295_v4  ;;  %vm337_vm12 = vweird.f32 %v2034_v5  ;;  %v2036_v31 = vpop.eup %2035 }
 0x1b4   :  { %v413_v58 = vmax.f32 %v405_v56, 0.0  ;;  %vm338_vm13 = vmor %vm336_vm11, %vm337_vm12  ;;  %v519_v32 = vmul.f32 64.0, %v2036_v31  ;;  %vm523_vm15 = vweird.f32 %v2036_v31 }
 0x1b5   :  { %v329_v59 = vsel %vm328_vm10, %v2032_v43, %v325_v57  ;;  %v332_v7 = vmul.f32 %v2034_v5, %v331_v6 }
 0x1b6   :  { %1932 = vmatmul.msk.f32.gmra.mxu1 %vm139_vm0, %v413_v58  ;;  %v382_v60 = vmul.f32 %v329_v59, %v2482_v55  ;;  %v520_v34 = vsub.f32 1.0, %v519_v32  ;;  %v2619_v32 = vld [vmem:[#allocation6 + $0x50] sm:$0xff] }
 0x1b7   :  { %v333_v8 = vmul.f32 0.5, %v332_v7 }
 0x1b8   :  { %v394_v62 = vmul.f32 %v2527_v33, %v382_v60  ;;  %v521_v54 = vmul.f32 %v2036_v31, %v520_v34 }
 0x1b9   :  { %v334_v10 = vsub.f32 1.5, %v333_v8 }
 0x1ba   :  { %v406_v47 = vadd.f32 %v2533_v37, %v394_v62  ;;  %v522_v39 = vadd.f32 %v2036_v31, %v521_v54 }
 0x1bb   :  { %v335_v55 = vmul.f32 %v2034_v5, %v334_v10 }
 0x1bc   :  { %v414_v0 = vmax.f32 %v406_v47, 0.0  ;;  %v2576_v43 = vsel %vm523_vm15, %v2036_v31, %v522_v39 }
 0x1bd   :  { %v339_v11 = vsel %vm338_vm13, %v2034_v5, %v335_v55 }
 0x1be   :  { %1933 = vmatmul.msk.f32.gmra.mxu1 %vm139_vm0, %v414_v0  ;;  %v383_v12 = vmul.f32 %v339_v11, %v2490_v61  ;;  %v2560_v61 = vsub.f32 %v2459_v26, %v240_v17  ;;  %v259_v26 = vmul.f32 %v2568_v9, %v2568_v9 }
 0x1bf   :  { %v280_v42 = vpop.xlane.xlu0 %279 }
 0x1c0   :  { %v395_v13 = vmul.f32 %v2527_v33, %v383_v12  ;;  %v256_v23 = vmul.f32 %v2560_v61, %v2560_v61  ;;  %v281_v29 = vsel %vm139_vm0, %v259_v26, 0.0  ;;  %v290_v45 = vmul.f32 %v280_v42, %v2464_v38  ;;  %v2608_v26 = vld [vmem:[#allocation6 + $0x68] sm:$0xff] }
 0x1c2   :  { %v407_v14 = vadd.f32 %v2533_v37, %v395_v13  ;;  %v272_v28 = vsel %vm139_vm0, %v256_v23, 0.0  ;;  %v2582_v49 = vadd.f32 1e-05, %v290_v45 }
 0x1c4   :  { %v415_v15 = vmax.f32 %v407_v14, 0.0  ;;  %vm366_vm7 = vweird.f32 %v2582_v49 }
 0x1c6   :  { %1934 = vmatmul.msk.f32.gmra.mxu1 %vm139_vm0, %v415_v15 }
 0x212   :  { %v277_v35 = vpop.xlane.xlu2 %276 }
 0x213   :  { %v289_v36 = vmul.f32 %v277_v35, %v2464_v38 }
 0x215   :  { %v297_v40 = vadd.f32 1e-05, %v289_v36  ;;  %v2624_v36 = vld [vmem:[#allocation6 + $0x48] sm:$0xff] }
 0x217   :  { %2037 = vrsqrt.f32 %v297_v40  ;;  %vm356_vm1 = vweird.f32 %v297_v40 }
 0x218   :  { %2039 = vrsqrt.f32 %v2582_v49 }
 0x21d   :  { %v2038_v50 = vpop.eup %2037 }
 0x21e   :  { %v351_v58 = vmul.f32 %v2038_v50, %v297_v40  ;;  %v2040_v63 = vpop.eup %2039  ;;  %vm357_vm2 = vweird.f32 %v2038_v50 }
 0x21f   :  { %v361_v4 = vmul.f32 %v2040_v63, %v2582_v49  ;;  %vm2597_vm4 = vmor %vm356_vm1, %vm357_vm2  ;;  %vm367_vm8 = vweird.f32 %v2040_v63 }
 0x220   :  { %v352_v47 = vmul.f32 %v2038_v50, %v351_v58  ;;  %vm368_vm9 = vmor %vm366_vm7, %vm367_vm8  ;;  %v723_v58 = vld [vmem:[#allocation3 + $0x70] sm:$0xff] }
 0x221   :  { %v362_v10 = vmul.f32 %v2040_v63, %v361_v4  ;;  %763 = vmatpush.msra.mxu2 %v723_v58  ;;  %v716_v4 = vld [vmem:[#allocation3 + $0x38] sm:$0xff]  ;;  %v870_v58 = vld [vmem:[%s3086_s2] sm:$0xff] }
 0x222   :  { %v353_v5 = vmul.f32 0.5, %v352_v47  ;;  %v722_v47 = vld [vmem:[#allocation3 + $0x68] sm:$0xff] }
 0x223   :  { %v363_v13 = vmul.f32 0.5, %v362_v10  ;;  %v709_v10 = vld [vmem:[#allocation3] sm:$0xff] }
 0x224   :  { %v354_v55 = vsub.f32 1.5, %v353_v5  ;;  %v713_v5 = vld [vmem:[#allocation3 + $0x20] sm:$0xff] }
 0x226   :  { %v355_v14 = vmul.f32 %v2038_v50, %v354_v55  ;;  %v710_v55 = vld [vmem:[#allocation3 + $0x8] sm:$0xff] }
 0x228   :  { %v359_v22 = vsel %vm2597_vm4, %v2038_v50, %v355_v14  ;;  %v2655_v14 = vld [vmem:[#allocation6 + $0x18] sm:$0xff] }
 0x229   :  { %v385_v31 = vmul.f32 %v359_v22, %v2518_v19  ;;  %v869_v22 = vld [vmem:[%s3085_s0] sm:$0xff] }
 0x22b   :  { %v469_v18 = vpop.f32.mrf.mxu1  ;;  %v397_v39 = vmul.f32 %v2527_v33, %v385_v31 }
 0x22c   :  { %v470_v20 = vadd.f32 %v2554_v16, %v469_v18 }
 0x22e   :  { %v494_v21 = vsel %vm493_vm14, %v470_v20, 0.0 }
 0x22f   :  { %495 = vadd.xlane.f32.xlu1 %v494_v21  ;;  %v364_v21 = vsub.f32 1.5, %v363_v13  ;;  %v2651_v13 = vld [vmem:[#allocation6 + $0x20] sm:$0xff] }
 0x231   :  { %v365_v34 = vmul.f32 %v2040_v63, %v364_v21 }
 0x233   :  { %v472_v24 = vpop.f32.mrf.mxu1  ;;  %v369_v40 = vsel %vm368_vm9, %v2040_v63, %v365_v34  ;;  %v719_v63 = vld [vmem:[#allocation3 + $0x50] sm:$0xff] }
 0x234   :  { %v473_v25 = vadd.f32 %v2554_v16, %v472_v24  ;;  %v386_v45 = vmul.f32 %v369_v40, %v2496_v2 }
 0x236   :  { %v497_v27 = vsel %vm493_vm14, %v473_v25, 0.0 }
 0x237   :  { %498 = vadd.xlane.f32.xlu0 %v497_v27  ;;  %273 = vadd.xlane.f32.xlu1 %v272_v28  ;;  %v2604_v27 = vld [vmem:[#allocation6 + $0x78] sm:$0xff]  ;;  %v2606_v28 = vld [vmem:[#allocation6 + $0x70] sm:$0xff] }
 0x238   :  { %913 = vmatpush.msrb.mxu1 %v2604_v27  ;;  %893 = vmatpush.msrb.mxu0 %v2606_v28 }
 0x23a   :  { %914 = vmatpush.msrb.mxu1 %v2608_v26 }
 0x23f   :  { %282 = vadd.xlane.f32.xlu1 %v281_v29  ;;  %v2613_v29 = vld [vmem:[#allocation6 + $0x60] sm:$0xff] }
 0x240   :  { %894 = vmatpush.msrb.mxu0 %v2613_v29 }
 0x242   :  { %895 = vmatpush.msrb.mxu0 %v2619_v32 }
 0x258   :  { %976 = vrot.lane.b32.xlu1 %v870_v58, %s2299_s21 }
 0x2a2   :  { %v496_v44 = vpop.xlane.xlu1 %495 }
 0x2a3   :  { %v525_v46 = vmul.f32 %v2576_v43, %v496_v44  ;;  %v409_v44 = vadd.f32 %v2533_v37, %v397_v39 }
 0x2a5   :  { %v2580_v48 = vsub.f32 %v470_v20, %v525_v46  ;;  %v417_v49 = vmax.f32 %v409_v44, 0.0 }
 0x2a7   :  { %v541_v41 = vmul.f32 %v2580_v48, %v2580_v48 }
 0x2a9   :  { %v549_v51 = vsel %vm493_vm14, %v541_v41, 0.0  ;;  %v398_v41 = vmul.f32 %v2527_v33, %v386_v45 }
 0x2aa   :  { %v274_v52 = vpop.xlane.xlu1 %273  ;;  %550 = vadd.xlane.f32.xlu2 %v549_v51  ;;  %v499_v53 = vpop.xlane.xlu0 %498 }
 0x2ab   :  { %v288_v56 = vmul.f32 %v274_v52, %v2464_v38  ;;  %v526_v57 = vmul.f32 %v2576_v43, %v499_v53  ;;  %v410_v51 = vadd.f32 %v2533_v37, %v398_v41 }
 0x2ad   :  { %v296_v59 = vadd.f32 1e-05, %v288_v56  ;;  %v2590_v60 = vsub.f32 %v473_v25, %v526_v57  ;;  %v418_v53 = vmax.f32 %v410_v51, 0.0 }
 0x2af   :  { %2041 = vrsqrt.f32 %v296_v59  ;;  %v542_v62 = vmul.f32 %v2590_v60, %v2590_v60  ;;  %vm346_vm5 = vweird.f32 %v296_v59 }
 0x2b1   :  { %v552_v0 = vsel %vm493_vm14, %v542_v62, 0.0  ;;  %v721_v62 = vld [vmem:[#allocation3 + $0x60] sm:$0xff] }
 0x2b2   :  { %v283_v1 = vpop.xlane.xlu1 %282  ;;  %553 = vadd.xlane.f32.xlu0 %v552_v0  ;;  %764 = vmatpush.msra.mxu2 %v721_v62  ;;  %v718_v0 = vld [vmem:[#allocation3 + $0x48] sm:$0xff]  ;;  %v2763_v62 = vpop.f32.mrf.mxu1 }
 0x2b3   :  { %v291_v3 = vmul.f32 %v283_v1, %v2464_v38  ;;  %v2641_v1 = vld [vmem:[#allocation6 + $0x40] sm:$0xff]  ;;  %v2659_v38 = vld [vmem:[#allocation6 + $0x8] sm:$0xff] }
 0x2b4   :  { %765 = vmatpush.msra.mxu2 %v719_v63  ;;  %896 = vmatpush.msrb.mxu0 %v2641_v1 }
 0x2b5   :  { %v2042_v6 = vpop.eup %2041  ;;  %v299_v7 = vadd.f32 1e-05, %v291_v3  ;;  %v715_v3 = vld [vmem:[#allocation3 + $0x30] sm:$0xff] }
 0x2b6   :  { %v341_v8 = vmul.f32 %v2042_v6, %v296_v59  ;;  %vm347_vm3 = vweird.f32 %v2042_v6  ;;  %v724_v59 = vld [vmem:[#allocation3 + $0x78] sm:$0xff] }
 0x2b7   :  { %2043 = vrsqrt.f32 %v299_v7  ;;  %vm348_vm6 = vmor %vm346_vm5, %vm347_vm3  ;;  %vm376_vm11 = vweird.f32 %v299_v7  ;;  %804 = vmatpush.msra.mxu3 %v724_v59 }
 0x2b8   :  { %v342_v11 = vmul.f32 %v2042_v6, %v341_v8  ;;  %v712_v8 = vld [vmem:[#allocation3 + $0x18] sm:$0xff] }
 0x2b9   :  { %805 = vmatpush.msra.mxu3 %v722_v47 }
 0x2ba   :  { %v343_v12 = vmul.f32 0.5, %v342_v11  ;;  %v2647_v11 = vld [vmem:[#allocation6 + $0x30] sm:$0xff]  ;;  %v2765_v47 = vpop.f32.mrf.mxu1 }
 0x2bb   :  { %897 = vmatpush.msrb.mxu0 %v2647_v11 }
 0x2bc   :  { %v344_v15 = vsub.f32 1.5, %v343_v12  ;;  %v2649_v12 = vld [vmem:[#allocation6 + $0x28] sm:$0xff] }
 0x2bd   :  { %v2044_v17 = vpop.eup %2043  ;;  %898 = vmatpush.msrb.mxu0 %v2651_v13 }
 0x2be   :  { %v345_v18 = vmul.f32 %v2042_v6, %v344_v15  ;;  %v371_v20 = vmul.f32 %v2044_v17, %v299_v7  ;;  %vm377_vm10 = vweird.f32 %v2044_v17  ;;  %v711_v7 = vld [vmem:[#allocation3 + $0x10] sm:$0xff] }
 0x2bf   :  { %vm378_vm12 = vmor %vm376_vm11, %vm377_vm10 }
 0x2c0   :  { %v349_v23 = vsel %vm348_vm6, %v2042_v6, %v345_v18  ;;  %v372_v24 = vmul.f32 %v2044_v17, %v371_v20  ;;  %v714_v6 = vld [vmem:[#allocation3 + $0x28] sm:$0xff]  ;;  %v2666_v20 = vld [vmem:[#allocation6] sm:$0xff] }
 0x2c1   :  { %v384_v25 = vmul.f32 %v349_v23, %v2560_v61  ;;  %v2617_v61 = vld [vmem:[#allocation6 + $0x58] sm:$0xff] }
 0x2c2   :  { %v373_v35 = vmul.f32 0.5, %v372_v24  ;;  %915 = vmatpush.msrb.mxu1 %v2617_v61 }
 0x2c3   :  { %v396_v30 = vmul.f32 %v2527_v33, %v384_v25 }
 0x2c4   :  { %v374_v42 = vsub.f32 1.5, %v373_v35  ;;  %916 = vmatpush.msrb.mxu1 %v2624_v36 }
 0x2c5   :  { %v408_v54 = vadd.f32 %v2533_v37, %v396_v30 }
 0x2c6   :  { %v375_v46 = vmul.f32 %v2044_v17, %v374_v42  ;;  %v2711_v42 = vld [vmem:[%s3068_s9] ss:$0 sm:$0xff] }
 0x2c7   :  { %v416_v19 = vmax.f32 %v408_v54, 0.0 }
 0x2c8   :  { %v379_v50 = vsel %vm378_vm12, %v2044_v17, %v375_v46  ;;  %v2657_v17 = vld [vmem:[#allocation6 + $0x10] sm:$0xff] }
 0x2c9   :  { %1935 = vmatmul.msk.f32.gmra.mxu1 %vm139_vm0, %v416_v19  ;;  %v387_v52 = vmul.f32 %v379_v50, %v2568_v9  ;;  %v720_v9 = vld [vmem:[#allocation3 + $0x58] sm:$0xff]  ;;  %899 = vmatpush.msrb.mxu0 %v2657_v17 }
 0x2ca   :  { %806 = vmatpush.msra.mxu3 %v720_v9 }
 0x2cb   :  { %v399_v56 = vmul.f32 %v2527_v33, %v387_v52  ;;  %v717_v33 = vld [vmem:[#allocation3 + $0x40] sm:$0xff]  ;;  %900 = vmatpush.msrb.mxu0 %v2666_v20 }
 0x2cc   :  { %766 = vmatpush.msra.mxu2 %v717_v33  ;;  %807 = vmatpush.msra.mxu3 %v718_v0 }
 0x2cd   :  { %v411_v2 = vadd.f32 %v2533_v37, %v399_v56  ;;  %v2643_v37 = vld [vmem:[#allocation6 + $0x38] sm:$0xff]  ;;  %1003 = vmatpush.msra.mxu0 %v2606_v28 }
 0x2ce   :  { %917 = vmatpush.msrb.mxu1 %v2643_v37  ;;  %767 = vmatpush.msra.mxu2 %v715_v3  ;;  %v871_v3 = vlaneseq }
 0x2cf   :  { %v419_v57 = vmax.f32 %v411_v2, 0.0  ;;  %808 = vmatpush.msra.mxu3 %v716_v4  ;;  %1955 = vmatmul.msk.f32.vlgmr.msrb.gmra.mxu0 %vm493_vm14, %v869_v22  ;;  %v725_v4 = vld [vmem:[%s3072_s13] sm:$0x3] }
 0x2d0   :  { %768 = vmatpush.msra.mxu2 %v713_v5  ;;  %918 = vmatpush.msrb.mxu1 %v2649_v12  ;;  %v2778_v5 = vand.u32 127, %v871_v3 }
 0x2d1   :  { %1936 = vmatmul.msk.f32.gmra.mxu1 %vm139_vm0, %v417_v49  ;;  %809 = vmatpush.msra.mxu3 %v714_v6  ;;  %v2719_v49 = vld [vmem:[%s3069_s10] ss:$0 sm:$0xff]  ;;  %v2780_v6 = vperm.slane %v725_v4, 0 }
 0x2d2   :  { %769 = vmatpush.msra.mxu2 %v711_v7  ;;  %919 = vmatpush.msrb.mxu1 %v2655_v14  ;;  %v2782_v7 = vperm.slane %v725_v4, 1 }
 0x2d3   :  { %810 = vmatpush.msra.mxu3 %v712_v8  ;;  %1004 = vmatpush.msra.mxu0 %v2613_v29 }
 0x2d4   :  { %770 = vmatpush.msra.mxu2 %v709_v10  ;;  %920 = vmatpush.msrb.mxu1 %v2659_v38 }
 0x2d5   :  { %811 = vmatpush.msra.mxu3 %v710_v55  ;;  %1005 = vmatpush.msra.mxu0 %v2619_v32 }
 0x2d6   :  { %1215 = vmatpush.msrb.mxu2 %v2606_v28  ;;  %1023 = vmatpush.msra.mxu1 %v2604_v27 }
 0x2d7   :  { %1235 = vmatpush.msrb.mxu3 %v2604_v27  ;;  %1006 = vmatpush.msra.mxu0 %v2641_v1 }
 0x2d8   :  { %1216 = vmatpush.msrb.mxu2 %v2613_v29  ;;  %1024 = vmatpush.msra.mxu1 %v2608_v26 }
 0x2d9   :  { %1937 = vmatmul.msk.f32.gmra.mxu1 %vm139_vm0, %v418_v53  ;;  %1236 = vmatpush.msrb.mxu3 %v2608_v26 }
 0x2da   :  { %1217 = vmatpush.msrb.mxu2 %v2619_v32  ;;  %1025 = vmatpush.msra.mxu1 %v2617_v61 }
 0x2db   :  { %1237 = vmatpush.msrb.mxu3 %v2617_v61  ;;  %1007 = vmatpush.msra.mxu0 %v2647_v11 }
 0x2dc   :  { %1218 = vmatpush.msrb.mxu2 %v2641_v1  ;;  %1026 = vmatpush.msra.mxu1 %v2624_v36 }
 0x2dd   :  { %1238 = vmatpush.msrb.mxu3 %v2624_v36  ;;  %1008 = vmatpush.msra.mxu0 %v2651_v13 }
 0x2de   :  { %1219 = vmatpush.msrb.mxu2 %v2647_v11  ;;  %1027 = vmatpush.msra.mxu1 %v2643_v37 }
 0x2df   :  { %1239 = vmatpush.msrb.mxu3 %v2643_v37  ;;  %1009 = vmatpush.msra.mxu0 %v2657_v17 }
 0x2e0   :  { %1220 = vmatpush.msrb.mxu2 %v2651_v13  ;;  %1028 = vmatpush.msra.mxu1 %v2649_v12 }
 0x2e1   :  { %1938 = vmatmul.msk.f32.gmra.mxu1 %vm139_vm0, %v419_v57  ;;  %1240 = vmatpush.msrb.mxu3 %v2649_v12 }
 0x2e2   :  { %1221 = vmatpush.msrb.mxu2 %v2657_v17  ;;  %1029 = vmatpush.msra.mxu1 %v2655_v14 }
 0x2e3   :  { %1241 = vmatpush.msrb.mxu3 %v2655_v14  ;;  %1010 = vmatpush.msra.mxu0 %v2666_v20 }
 0x2e4   :  { %1222 = vmatpush.msrb.mxu2 %v2666_v20  ;;  %1030 = vmatpush.msra.mxu1 %v2659_v38 }
 0x2e5   :  { %1242 = vmatpush.msrb.mxu3 %v2659_v38  ;;  %1109 = vmatpush.msrb.mxu0 %v2606_v28 }
 0x2e7   :  { %1110 = vmatpush.msrb.mxu0 %v2613_v29 }
 0x2e9   :  { %1956 = vmatmul.msk.f32.vlgmr.msrb.gmra.mxu1 %vm493_vm14, %v869_v22  ;;  %1111 = vmatpush.msrb.mxu0 %v2619_v32 }
 0x2ea   :  { %1129 = vmatpush.msrb.mxu1 %v2604_v27 }
 0x2eb   :  { %1112 = vmatpush.msrb.mxu0 %v2641_v1 }
 0x2ec   :  { %1130 = vmatpush.msrb.mxu1 %v2608_v26 }
 0x2ed   :  { %1113 = vmatpush.msrb.mxu0 %v2647_v11 }
 0x2ee   :  { %1131 = vmatpush.msrb.mxu1 %v2617_v61 }
 0x2ef   :  { %1114 = vmatpush.msrb.mxu0 %v2651_v13 }
 0x2f0   :  { %1132 = vmatpush.msrb.mxu1 %v2624_v36 }
 0x2f1   :  { %1115 = vmatpush.msrb.mxu0 %v2657_v17 }
 0x2f2   :  { %1133 = vmatpush.msrb.mxu1 %v2643_v37 }
 0x2f3   :  { %1116 = vmatpush.msrb.mxu0 %v2666_v20 }
 0x2f4   :  { %1134 = vmatpush.msrb.mxu1 %v2649_v12 }
 0x2f6   :  { %1135 = vmatpush.msrb.mxu1 %v2655_v14 }
 0x2f8   :  { %1136 = vmatpush.msrb.mxu1 %v2659_v38 }
 0x31d   :  { %v551_v15 = vpop.xlane.xlu2 %550 }
 0x31e   :  { %v573_v18 = vmul.f32 %v551_v15, %v2576_v43 }
 0x320   :  { %v581_v21 = vadd.f32 1e-05, %v573_v18  ;;  %v2785_v18 = vadd.s32 128, %v2778_v5 }
 0x322   :  { %2045 = vrsqrt.f32 %v581_v21  ;;  %vm595_vm13 = vweird.f32 %v581_v21  ;;  %vm877_vm4 = vcmp.lt.s32.totalorder %v2785_v18, 192  ;;  %v1737_v18 = vld [vmem:[#allocation8 + $0x38] sm:$0xff] }
 0x325   :  { %v554_v23 = vpop.xlane.xlu0 %553 }
 0x326   :  { %v574_v24 = vmul.f32 %v554_v23, %v2576_v43 }
 0x328   :  { %v2046_v25 = vpop.eup %2045  ;;  %v582_v30 = vadd.f32 1e-05, %v574_v24 }
 0x329   :  { %v590_v31 = vmul.f32 %v2046_v25, %v581_v21  ;;  %vm596_vm0 = vweird.f32 %v2046_v25 }
 0x32a   :  { %2047 = vrsqrt.f32 %v582_v30  ;;  %vm597_vm15 = vmor %vm595_vm13, %vm596_vm0  ;;  %vm605_vm2 = vweird.f32 %v582_v30 }
 0x32b   :  { %v591_v34 = vmul.f32 %v2046_v25, %v590_v31 }
 0x32d   :  { %v592_v35 = vmul.f32 0.5, %v591_v34 }
 0x32f   :  { %v593_v54 = vsub.f32 1.5, %v592_v35 }
 0x330   :  { %v2048_v19 = vpop.eup %2047 }
 0x331   :  { %v594_v39 = vmul.f32 %v2046_v25, %v593_v54  ;;  %v600_v40 = vmul.f32 %v2048_v19, %v582_v30  ;;  %vm606_vm1 = vweird.f32 %v2048_v19 }
 0x332   :  { %vm607_vm3 = vmor %vm605_vm2, %vm606_vm1 }
 0x333   :  { %v598_v44 = vsel %vm597_vm15, %v2046_v25, %v594_v39  ;;  %v601_v45 = vmul.f32 %v2048_v19, %v600_v40 }
 0x334   :  { %v669_v46 = vmul.f32 %v598_v44, %v2580_v48 }
 0x335   :  { %v602_v41 = vmul.f32 0.5, %v601_v45 }
 0x336   :  { %v681_v50 = vmul.f32 %v2711_v42, %v669_v46 }
 0x337   :  { %v603_v51 = vsub.f32 1.5, %v602_v41 }
 0x338   :  { %v693_v48 = vadd.f32 %v2719_v49, %v681_v50 }
 0x339   :  { %v604_v52 = vmul.f32 %v2048_v19, %v603_v51 }
 0x33a   :  { %v701_v53 = vmax.f32 %v693_v48, 0.0 }
 0x33b   :  { %v608_v56 = vsel %vm607_vm3, %v2048_v19, %v604_v52 }
 0x33c   :  { %1939 = vmatmul.msk.f32.vlgmr.msra.gmra.mxu2 %vm493_vm14, %v701_v53  ;;  %1947 = vmatmul.msk.f32.vlgmr.msra.gmra.mxu3 %vm493_vm14, %v701_v53  ;;  %v670_v2 = vmul.f32 %v608_v56, %v2590_v60 }
 0x33d   :  { %1427 = vmatpush.msra.mxu2 %v2606_v28  ;;  %1447 = vmatpush.msra.mxu3 %v2604_v27 }
 0x33e   :  { %v682_v57 = vmul.f32 %v2711_v42, %v670_v2 }
 0x33f   :  { %1428 = vmatpush.msra.mxu2 %v2613_v29  ;;  %1448 = vmatpush.msra.mxu3 %v2608_v26 }
 0x340   :  { %v694_v60 = vadd.f32 %v2719_v49, %v682_v57 }
 0x341   :  { %1429 = vmatpush.msra.mxu2 %v2619_v32  ;;  %1449 = vmatpush.msra.mxu3 %v2617_v61 }
 0x342   :  { %v702_v59 = vmax.f32 %v694_v60, 0.0 }
 0x343   :  { %1430 = vmatpush.msra.mxu2 %v2641_v1  ;;  %1450 = vmatpush.msra.mxu3 %v2624_v36 }
 0x344   :  { %1940 = vmatmul.msk.f32.gmra.mxu2 %vm493_vm14, %v702_v59  ;;  %1948 = vmatmul.msk.f32.gmra.mxu3 %vm493_vm14, %v702_v59 }
 0x345   :  { %1431 = vmatpush.msra.mxu2 %v2647_v11  ;;  %1451 = vmatpush.msra.mxu3 %v2643_v37 }
 0x346   :  { %v2767_v63 = vpop.f32.mrf.mxu1 }
 0x347   :  { %1432 = vmatpush.msra.mxu2 %v2651_v13  ;;  %1452 = vmatpush.msra.mxu3 %v2649_v12 }
 0x349   :  { %1433 = vmatpush.msra.mxu2 %v2657_v17  ;;  %1453 = vmatpush.msra.mxu3 %v2655_v14 }
 0x34b   :  { %1434 = vmatpush.msra.mxu2 %v2666_v20  ;;  %1454 = vmatpush.msra.mxu3 %v2659_v38 }
 0x34c   :  { %v902_v8 = vpop.f32.mrf.mxu0 }
 0x34e   :  { %v2769_v9 = vpop.f32.mrf.mxu1 }
 0x356   :  { %v2771_v33 = vpop.f32.mrf.mxu1 }
 0x35e   :  { %v2773_v0 = vpop.f32.mrf.mxu1 }
 0x366   :  { %v922_v10 = vpop.f32.mrf.mxu1 }
 0x3bf   :  { %v772_v55 = vpop.f32.mrf.mxu2  ;;  %v813_v15 = vpop.f32.mrf.mxu3 }
 0x3c0   :  { %v773_v21 = vadd.f32 %v772_v55, %v2780_v6  ;;  %v814_v22 = vadd.f32 %v813_v15, %v2782_v7 }
 0x3c2   :  { %v925_v23 = vadd.f32 %v902_v8, %v773_v21  ;;  %v926_v24 = vadd.f32 %v922_v10, %v814_v22 }
 0x3c4   :  { %v1957_v25 = vmul.f32 -1.442695, %v925_v23  ;;  %v928_v30 = vadd.f32 %v926_v24, %v926_v24  ;;  %v2797_v23 = vadd.f32 %v2554_v16, %v2763_v62  ;;  %v491_v62 = vadd.f32 %v2554_v16, %v2773_v0 }
 0x3c6   :  { %2049 = vpow2.f32 %v1957_v25  ;;  %v930_v31 = vsel %vm877_vm4, %v928_v30, %v926_v24  ;;  %v500_v24 = vsel %vm493_vm14, %v2797_v23, 0.0  ;;  %v2803_v25 = vadd.f32 %v2554_v16, %v2767_v63 }
 0x3c7   :  { %v1958_v34 = vmul.f32 -1.442695, %v930_v31  ;;  %v485_v31 = vadd.f32 %v2554_v16, %v2769_v9 }
 0x3c8   :  { %v506_v30 = vsel %vm493_vm14, %v2803_v25, 0.0 }
 0x3c9   :  { %2051 = vpow2.f32 %v1958_v34  ;;  %v509_v34 = vsel %vm493_vm14, %v485_v31, 0.0 }
 0x3cc   :  { %v2050_v35 = vpop.eup %2049 }
 0x3cd   :  { %v937_v54 = vadd.f32 1.0, %v2050_v35  ;;  %v515_v35 = vsel %vm493_vm14, %v491_v62, 0.0 }
 0x3cf   :  { %v2052_v19 = vpop.eup %2051  ;;  %2053 = vrcp.f32 %v937_v54  ;;  %v950_v58 = vand.u32 2147483648, %v937_v54  ;;  %vm944_vm10 = vweird.f32 %v937_v54  ;;  %v948_v59 = vand.u32 2147483647, %v937_v54 }
 0x3d0   :  { %v938_v39 = vadd.f32 1.0, %v2052_v19 }
 0x3d1   :  { %v951_v10 = vor.u32 1.1754944e-38, %v950_v58  ;;  %vm949_vm12 = vcmp.eq.f32.partialorder %v948_v59, 8.507059e+37  ;;  %v775_v58 = vpop.f32.mrf.mxu2 }
 0x3d2   :  { %2055 = vrcp.f32 %v938_v39  ;;  %v965_v48 = vand.u32 2147483648, %v938_v39  ;;  %v963_v53 = vand.u32 2147483647, %v938_v39  ;;  %vm959_vm6 = vweird.f32 %v938_v39 }
 0x3d3   :  { %v776_v59 = vadd.f32 %v775_v58, %v2780_v6 }
 0x3d4   :  { %v966_v57 = vor.u32 1.1754944e-38, %v965_v48  ;;  %vm964_vm9 = vcmp.eq.f32.partialorder %v963_v53, 8.507059e+37 }
 0x3d5   :  { %v2054_v40 = vpop.eup %2053 }
 0x3d6   :  { %v940_v44 = vmul.f32 %v2054_v40, %v937_v54  ;;  %vm945_vm7 = vweird.f32 %v2054_v40  ;;  %v977_v54 = vpop.permute.xlu1 %976 }
 0x3d7   :  { %vm946_vm11 = vmor %vm944_vm10, %vm945_vm7 }
 0x3d8   :  { %v2056_v45 = vpop.eup %2055  ;;  %v941_v46 = vsub.f32 1.0, %v940_v44 }
 0x3d9   :  { %v955_v41 = vmul.f32 %v2056_v45, %v938_v39  ;;  %vm960_vm5 = vweird.f32 %v2056_v45 }
 0x3da   :  { %v942_v51 = vmul.f32 %v2054_v40, %v941_v46  ;;  %vm961_vm8 = vmor %vm959_vm6, %vm960_vm5 }
 0x3db   :  { %v956_v50 = vsub.f32 1.0, %v955_v41 }
 0x3dc   :  { %v943_v2 = vadd.f32 %v2054_v40, %v942_v51 }
 0x3dd   :  { %v957_v52 = vmul.f32 %v2056_v45, %v956_v50 }
 0x3de   :  { %v947_v8 = vsel %vm946_vm11, %v2054_v40, %v943_v2 }
 0x3df   :  { %v958_v56 = vadd.f32 %v2056_v45, %v957_v52  ;;  %v952_v15 = vsel %vm949_vm12, %v951_v10, %v947_v8 }
 0x3e0   :  { %v979_v19 = vmul.f32 %v977_v54, %v952_v15 }
 0x3e1   :  { %v962_v60 = vsel %vm961_vm8, %v2056_v45, %v958_v56 }
 0x3e2   :  { %v967_v3 = vsel %vm964_vm9, %v966_v57, %v962_v60  ;;  %v816_v60 = vpop.f32.mrf.mxu3 }
 0x3e3   :  { %v970_v4 = vadd.f32 %v967_v3, %v967_v3 }
 0x3e5   :  { %v1960_v55 = vadd.f32 -1.0, %v970_v4 }
 0x3e7   :  { %v974_v21 = vsel %vm877_vm4, %v1960_v55, %v967_v3  ;;  %v817_v3 = vadd.f32 %v816_v60, %v2782_v7 }
 0x3e8   :  { %v980_v22 = vmul.f32 %v974_v21, %v952_v15 }
 0x3ea   :  { %982 = vrot.lane.b32.xlu2 %v980_v22, %s2299_s21 }
 0x413   :  { %501 = vadd.xlane.f32.xlu2 %v500_v24 }
 0x41b   :  { %507 = vadd.xlane.f32.xlu2 %v506_v30 }
 0x423   :  { %510 = vadd.xlane.f32.xlu2 %v509_v34 }
 0x42b   :  { %516 = vadd.xlane.f32.xlu2 %v515_v35 }
 0x444   :  { %v983_v63 = vpop.permute.xlu2 %982 }
 0x445   :  { %v2813_v39 = vadd.f32 %v983_v63, %v979_v19 }
 0x447   :  { %2057 = vtanh.f32 %v2813_v39 }
 0x44d   :  { %v2058_v40 = vpop.eup %2057 }
 0x44e   :  { %v987_v44 = vmul.f32 %v2058_v40, %v974_v21 }
 0x450   :  { %991 = vrot.lane.b32.xlu0 %v987_v44, %s2299_s21 }
 0x486   :  { %v2817_v9 = vpop.xlane.xlu2 %501 }
 0x48e   :  { %v2819_v45 = vpop.xlane.xlu2 %507 }
 0x496   :  { %v511_v46 = vpop.xlane.xlu2 %510 }
 0x497   :  { %v530_v0 = vmul.f32 %v2576_v43, %v511_v46 }
 0x499   :  { %v2822_v41 = vsub.f32 %v485_v31, %v530_v0 }
 0x49b   :  { %v546_v50 = vmul.f32 %v2822_v41, %v2822_v41 }
 0x49d   :  { %v564_v51 = vsel %vm493_vm14, %v546_v50, 0.0 }
 0x49e   :  { %565 = vadd.xlane.f32.xlu2 %v564_v51  ;;  %v517_v48 = vpop.xlane.xlu2 %516 }
 0x49f   :  { %v532_v52 = vmul.f32 %v2576_v43, %v517_v48 }
 0x4a1   :  { %v2828_v53 = vsub.f32 %v491_v62, %v532_v52 }
 0x4a3   :  { %v548_v56 = vmul.f32 %v2828_v53, %v2828_v53 }
 0x4a5   :  { %v570_v2 = vsel %vm493_vm14, %v548_v56, 0.0 }
 0x4a6   :  { %571 = vadd.xlane.f32.xlu2 %v570_v2 }
 0x4c2   :  { %v992_v57 = vpop.permute.xlu0 %991 }
 0x4c3   :  { %1961 = vmatmul.msk.f32.vlgmr.msra.gmra.mxu0 %vm493_vm14, %v992_v57  ;;  %1962 = vmatmul.msk.f32.vlgmr.msra.gmra.mxu1 %vm493_vm14, %v992_v57 }
 0x4c4   :  { %1321 = vmatpush.msra.mxu0 %v2606_v28  ;;  %1341 = vmatpush.msra.mxu1 %v2604_v27 }
 0x4c6   :  { %1322 = vmatpush.msra.mxu0 %v2613_v29  ;;  %1342 = vmatpush.msra.mxu1 %v2608_v26 }
 0x4c8   :  { %1323 = vmatpush.msra.mxu0 %v2619_v32  ;;  %1343 = vmatpush.msra.mxu1 %v2617_v61 }
 0x4ca   :  { %1324 = vmatpush.msra.mxu0 %v2641_v1  ;;  %1344 = vmatpush.msra.mxu1 %v2624_v36 }
 0x4cc   :  { %1325 = vmatpush.msra.mxu0 %v2647_v11  ;;  %1345 = vmatpush.msra.mxu1 %v2643_v37 }
 0x4ce   :  { %1326 = vmatpush.msra.mxu0 %v2651_v13  ;;  %1346 = vmatpush.msra.mxu1 %v2649_v12 }
 0x4d0   :  { %1327 = vmatpush.msra.mxu0 %v2657_v17  ;;  %1347 = vmatpush.msra.mxu1 %v2655_v14 }
 0x4d2   :  { %1328 = vmatpush.msra.mxu0 %v2666_v20  ;;  %1348 = vmatpush.msra.mxu1 %v2659_v38 }
 0x540   :  { %v1012_v4 = vpop.f32.mrf.mxu0  ;;  %v1032_v8 = vpop.f32.mrf.mxu1 }
 0x541   :  { %v1035_v10 = vadd.f32 %v1012_v4, %v776_v59  ;;  %v1036_v55 = vadd.f32 %v1032_v8, %v817_v3 }
 0x543   :  { %v1963_v15 = vmul.f32 -1.442695, %v1035_v10  ;;  %v1038_v21 = vadd.f32 %v1036_v55, %v1036_v55 }
 0x545   :  { %2059 = vpow2.f32 %v1963_v15  ;;  %v1040_v22 = vsel %vm877_vm4, %v1038_v21, %v1036_v55  ;;  %v527_v21 = vmul.f32 %v2576_v43, %v2817_v9 }
 0x546   :  { %v1964_v24 = vmul.f32 -1.442695, %v1040_v22 }
 0x547   :  { %v535_v22 = vsub.f32 %v2797_v23, %v527_v21 }
 0x548   :  { %2061 = vpow2.f32 %v1964_v24 }
 0x549   :  { %v543_v24 = vmul.f32 %v535_v22, %v535_v22 }
 0x54b   :  { %v2060_v30 = vpop.eup %2059 }
 0x54c   :  { %v1047_v31 = vadd.f32 1.0, %v2060_v30  ;;  %v555_v30 = vsel %vm493_vm14, %v543_v24, 0.0 }
 0x54e   :  { %v2062_v34 = vpop.eup %2061  ;;  %2063 = vrcp.f32 %v1047_v31  ;;  %v1060_v2 = vand.u32 2147483648, %v1047_v31  ;;  %vm1054_vm3 = vweird.f32 %v1047_v31  ;;  %v1058_v58 = vand.u32 2147483647, %v1047_v31 }
 0x54f   :  { %v1048_v62 = vadd.f32 1.0, %v2062_v34 }
 0x550   :  { %v1061_v4 = vor.u32 1.1754944e-38, %v1060_v2  ;;  %vm1059_vm6 = vcmp.eq.f32.partialorder %v1058_v58, 8.507059e+37 }
 0x551   :  { %2065 = vrcp.f32 %v1048_v62  ;;  %v1075_v0 = vand.u32 2147483648, %v1048_v62  ;;  %v1073_v51 = vand.u32 2147483647, %v1048_v62  ;;  %vm1069_vm13 = vweird.f32 %v1048_v62 }
 0x553   :  { %v1076_v56 = vor.u32 1.1754944e-38, %v1075_v0  ;;  %vm1074_vm2 = vcmp.eq.f32.partialorder %v1073_v51, 8.507059e+37 }
 0x554   :  { %v2064_v35 = vpop.eup %2063 }
 0x555   :  { %v1050_v54 = vmul.f32 %v2064_v35, %v1047_v31  ;;  %vm1055_vm15 = vweird.f32 %v2064_v35  ;;  %v488_v31 = vadd.f32 %v2554_v16, %v2771_v33  ;;  %v479_v33 = vadd.f32 %v2554_v16, %v2765_v47 }
 0x556   :  { %vm1056_vm5 = vmor %vm1054_vm3, %vm1055_vm15 }
 0x557   :  { %v2066_v19 = vpop.eup %2065  ;;  %v1051_v63 = vsub.f32 1.0, %v1050_v54  ;;  %v512_v34 = vsel %vm493_vm14, %v488_v31, 0.0 }
 0x558   :  { %v1065_v40 = vmul.f32 %v2066_v19, %v1048_v62  ;;  %vm1070_vm0 = vweird.f32 %v2066_v19 }
 0x559   :  { %v1052_v46 = vmul.f32 %v2064_v35, %v1051_v63  ;;  %vm1071_vm1 = vmor %vm1069_vm13, %vm1070_vm0 }
 0x55a   :  { %v1066_v44 = vsub.f32 1.0, %v1065_v40 }
 0x55b   :  { %v1053_v52 = vadd.f32 %v2064_v35, %v1052_v46  ;;  %v503_v46 = vsel %vm493_vm14, %v479_v33, 0.0 }
 0x55c   :  { %v1067_v50 = vmul.f32 %v2066_v19, %v1066_v44 }
 0x55d   :  { %v1057_v3 = vsel %vm1056_vm5, %v2064_v35, %v1053_v52 }
 0x55e   :  { %v1068_v48 = vadd.f32 %v2066_v19, %v1067_v50  ;;  %v1062_v10 = vsel %vm1059_vm6, %v1061_v4, %v1057_v3 }
 0x55f   :  { %v1085_v62 = vmul.f32 %v1062_v10, %v2813_v39  ;;  %v529_v39 = vmul.f32 %v2576_v43, %v2819_v45 }
 0x560   :  { %v1072_v57 = vsel %vm1071_vm1, %v2066_v19, %v1068_v48 }
 0x561   :  { %v1077_v60 = vsel %vm1074_vm2, %v1076_v56, %v1072_v57  ;;  %v2876_v44 = vsub.f32 %v2803_v25, %v529_v39 }
 0x562   :  { %v1080_v59 = vadd.f32 %v1077_v60, %v1077_v60 }
 0x563   :  { %v545_v56 = vmul.f32 %v2876_v44, %v2876_v44 }
 0x564   :  { %v1966_v8 = vadd.f32 -1.0, %v1080_v59 }
 0x565   :  { %v561_v25 = vsel %vm493_vm14, %v545_v56, 0.0 }
 0x566   :  { %v1084_v55 = vsel %vm877_vm4, %v1966_v8, %v1077_v60 }
 0x567   :  { %v1086_v15 = vmul.f32 %v1084_v55, %v1062_v10 }
 0x569   :  { %1088 = vrot.lane.b32.xlu1 %v1086_v15, %s2299_s21 }
 0x593   :  { %556 = vadd.xlane.f32.xlu1 %v555_v30 }
 0x59b   :  { %513 = vadd.xlane.f32.xlu1 %v512_v34 }
 0x5db   :  { %v1089_v35 = vpop.permute.xlu1 %1088 }
 0x5dc   :  { %v2866_v54 = vadd.f32 %v1089_v35, %v1085_v62 }
 0x5de   :  { %2067 = vtanh.f32 %v2866_v54 }
 0x5e4   :  { %v2068_v9 = vpop.eup %2067 }
 0x5e5   :  { %v1093_v19 = vmul.f32 %v2068_v9, %v1084_v55 }
 0x5e7   :  { %1097 = vrot.lane.b32.xlu0 %v1093_v19, %s2299_s21 }
 0x606   :  { %v557_v23 = vpop.xlane.xlu1 %556 }
 0x607   :  { %v575_v63 = vmul.f32 %v557_v23, %v2576_v43 }
 0x609   :  { %v583_v40 = vadd.f32 1e-05, %v575_v63 }
 0x60b   :  { %2069 = vrsqrt.f32 %v583_v40  ;;  %vm615_vm8 = vweird.f32 %v583_v40 }
 0x60e   :  { %v514_v50 = vpop.xlane.xlu1 %513 }
 0x60f   :  { %v531_v52 = vmul.f32 %v2576_v43, %v514_v50 }
 0x611   :  { %v2070_v0 = vpop.eup %2069  ;;  %504 = vadd.xlane.f32.xlu0 %v503_v46  ;;  %v2882_v47 = vsub.f32 %v488_v31, %v531_v52  ;;  %v566_v46 = vpop.xlane.xlu2 %565 }
 0x612   :  { %v610_v51 = vmul.f32 %v2070_v0, %v583_v40  ;;  %vm616_vm7 = vweird.f32 %v2070_v0  ;;  %v578_v52 = vmul.f32 %v566_v46, %v2576_v43 }
 0x613   :  { %vm617_vm9 = vmor %vm615_vm8, %vm616_vm7  ;;  %v547_v58 = vmul.f32 %v2882_v47, %v2882_v47 }
 0x614   :  { %v611_v48 = vmul.f32 %v2070_v0, %v610_v51 }
 0x615   :  { %v567_v3 = vsel %vm493_vm14, %v547_v58, 0.0  ;;  %v586_v58 = vadd.f32 1e-05, %v578_v52 }
 0x616   :  { %v612_v2 = vmul.f32 0.5, %v611_v48 }
 0x618   :  { %v613_v16 = vsub.f32 1.5, %v612_v2 }
 0x619   :  { %562 = vadd.xlane.f32.xlu0 %v561_v25 }
 0x61a   :  { %v614_v45 = vmul.f32 %v2070_v0, %v613_v16 }
 0x61c   :  { %v618_v57 = vsel %vm617_vm9, %v2070_v0, %v614_v45 }
 0x61d   :  { %v671_v60 = vmul.f32 %v618_v57, %v535_v22 }
 0x61f   :  { %v683_v59 = vmul.f32 %v2711_v42, %v671_v60 }
 0x621   :  { %568 = vadd.xlane.f32.xlu0 %v567_v3  ;;  %v695_v4 = vadd.f32 %v2719_v49, %v683_v59 }
 0x623   :  { %v703_v8 = vmax.f32 %v695_v4, 0.0 }
 0x625   :  { %1941 = vmatmul.msk.f32.gmra.mxu2 %vm493_vm14, %v703_v8  ;;  %1949 = vmatmul.msk.f32.gmra.mxu3 %vm493_vm14, %v703_v8 }
 0x659   :  { %v1098_v10 = vpop.permute.xlu0 %1097 }
 0x65a   :  { %1967 = vmatmul.msk.f32.vlgmr.msrb.gmra.mxu0 %vm493_vm14, %v1098_v10  ;;  %1968 = vmatmul.msk.f32.vlgmr.msrb.gmra.mxu1 %vm493_vm14, %v1098_v10 }
 0x65b   :  { %1533 = vmatpush.msrb.mxu0 %v2606_v28  ;;  %1553 = vmatpush.msrb.mxu1 %v2604_v27 }
 0x65d   :  { %1534 = vmatpush.msrb.mxu0 %v2613_v29  ;;  %1554 = vmatpush.msrb.mxu1 %v2608_v26 }
 0x65f   :  { %1535 = vmatpush.msrb.mxu0 %v2619_v32  ;;  %1555 = vmatpush.msrb.mxu1 %v2617_v61 }
 0x661   :  { %1536 = vmatpush.msrb.mxu0 %v2641_v1  ;;  %1556 = vmatpush.msrb.mxu1 %v2624_v36 }
 0x663   :  { %1537 = vmatpush.msrb.mxu0 %v2647_v11  ;;  %1557 = vmatpush.msrb.mxu1 %v2643_v37 }
 0x665   :  { %1538 = vmatpush.msrb.mxu0 %v2651_v13  ;;  %1558 = vmatpush.msrb.mxu1 %v2649_v12 }
 0x667   :  { %1539 = vmatpush.msrb.mxu0 %v2657_v17  ;;  %1559 = vmatpush.msrb.mxu1 %v2655_v14 }
 0x669   :  { %1540 = vmatpush.msrb.mxu0 %v2666_v20  ;;  %1560 = vmatpush.msrb.mxu1 %v2659_v38 }
 0x684   :  { %v505_v27 = vpop.xlane.xlu0 %504 }
 0x685   :  { %v528_v28 = vmul.f32 %v2576_v43, %v505_v27 }
 0x687   :  { %v2911_v26 = vsub.f32 %v479_v33, %v528_v28 }
 0x689   :  { %v544_v29 = vmul.f32 %v2911_v26, %v2911_v26 }
 0x68b   :  { %v558_v61 = vsel %vm493_vm14, %v544_v29, 0.0 }
 0x68c   :  { %559 = vadd.xlane.f32.xlu1 %v558_v61  ;;  %v563_v34 = vpop.xlane.xlu0 %562 }
 0x68d   :  { %v577_v19 = vmul.f32 %v563_v34, %v2576_v43 }
 0x68f   :  { %v585_v0 = vadd.f32 1e-05, %v577_v19 }
 0x691   :  { %vm635_vm6 = vweird.f32 %v585_v0 }
 0x694   :  { %v569_v3 = vpop.xlane.xlu0 %568 }
 0x695   :  { %v579_v29 = vmul.f32 %v569_v3, %v2576_v43 }
 0x6a8   :  { %v778_v32 = vpop.f32.mrf.mxu2  ;;  %v819_v36 = vpop.f32.mrf.mxu3 }
 0x6a9   :  { %v779_v1 = vadd.f32 %v778_v32, %v2780_v6  ;;  %v820_v37 = vadd.f32 %v819_v36, %v2782_v7 }
 0x6d7   :  { %v1118_v11 = vpop.f32.mrf.mxu0  ;;  %v1138_v12 = vpop.f32.mrf.mxu1 }
 0x6d8   :  { %v1141_v13 = vadd.f32 %v1118_v11, %v779_v1  ;;  %v1142_v14 = vadd.f32 %v1138_v12, %v820_v37  ;;  %v587_v1 = vadd.f32 1e-05, %v579_v29  ;;  %v572_v11 = vpop.xlane.xlu2 %571 }
 0x6da   :  { %v1969_v17 = vmul.f32 -1.442695, %v1141_v13  ;;  %v1144_v38 = vadd.f32 %v1142_v14, %v1142_v14 }
 0x6dc   :  { %2071 = vpow2.f32 %v1969_v17  ;;  %v1146_v20 = vsel %vm877_vm4, %v1144_v38, %v1142_v14  ;;  %v580_v14 = vmul.f32 %v572_v11, %v2576_v43 }
 0x6dd   :  { %v1970_v55 = vmul.f32 -1.442695, %v1146_v20 }
 0x6df   :  { %2073 = vpow2.f32 %v1970_v55 }
 0x6e2   :  { %v2072_v15 = vpop.eup %2071 }
 0x6e3   :  { %v1153_v21 = vadd.f32 1.0, %v2072_v15  ;;  %v588_v15 = vadd.f32 1e-05, %v580_v14 }
 0x6e5   :  { %v2074_v22 = vpop.eup %2073  ;;  %2075 = vrcp.f32 %v1153_v21  ;;  %v1166_v56 = vand.u32 2147483648, %v1153_v21  ;;  %vm1160_vm15 = vweird.f32 %v1153_v21  ;;  %v1164_v16 = vand.u32 2147483647, %v1153_v21 }
 0x6e6   :  { %v1154_v24 = vadd.f32 1.0, %v2074_v22 }
 0x6e7   :  { %v1167_v60 = vor.u32 1.1754944e-38, %v1166_v56  ;;  %vm1165_vm2 = vcmp.eq.f32.partialorder %v1164_v16, 8.507059e+37 }
 0x6e8   :  { %2077 = vrcp.f32 %v1154_v24  ;;  %v1181_v40 = vand.u32 2147483648, %v1154_v24  ;;  %v1179_v39 = vand.u32 2147483647, %v1154_v24  ;;  %vm1175_vm11 = vweird.f32 %v1154_v24 }
 0x6e9   :  { %2079 = vrsqrt.f32 %v585_v0 }
 0x6ea   :  { %v1182_v48 = vor.u32 1.1754944e-38, %v1181_v40  ;;  %vm1180_vm13 = vcmp.eq.f32.partialorder %v1179_v39, 8.507059e+37  ;;  %2081 = vrsqrt.f32 %v586_v58 }
 0x6eb   :  { %v2076_v30 = vpop.eup %2075 }
 0x6ec   :  { %v1156_v31 = vmul.f32 %v2076_v30, %v1153_v21  ;;  %vm1161_vm12 = vweird.f32 %v2076_v30 }
 0x6ed   :  { %vm1162_vm1 = vmor %vm1160_vm15, %vm1161_vm12 }
 0x6ee   :  { %v2078_v62 = vpop.eup %2077  ;;  %v1157_v35 = vsub.f32 1.0, %v1156_v31 }
 0x6ef   :  { %v1171_v9 = vmul.f32 %v2078_v62, %v1154_v24  ;;  %vm1176_vm10 = vweird.f32 %v2078_v62  ;;  %v2080_v10 = vpop.eup %2079 }
 0x6f0   :  { %v1158_v63 = vmul.f32 %v2076_v30, %v1157_v35  ;;  %vm1177_vm0 = vmor %vm1175_vm11, %vm1176_vm10  ;;  %v630_v32 = vmul.f32 %v2080_v10, %v585_v0  ;;  %v2082_v37 = vpop.eup %2081  ;;  %vm636_vm3 = vweird.f32 %v2080_v10  ;;  %vm645_vm11 = vweird.f32 %v586_v58 }
 0x6f1   :  { %v1172_v23 = vsub.f32 1.0, %v1171_v9  ;;  %v640_v13 = vmul.f32 %v2082_v37, %v586_v58  ;;  %vm637_vm7 = vmor %vm635_vm6, %vm636_vm3  ;;  %vm646_vm10 = vweird.f32 %v2082_v37 }
 0x6f2   :  { %v1159_v51 = vadd.f32 %v2076_v30, %v1158_v63  ;;  %v631_v12 = vmul.f32 %v2080_v10, %v630_v32  ;;  %vm647_vm12 = vmor %vm645_vm11, %vm646_vm10 }
 0x6f3   :  { %v1173_v33 = vmul.f32 %v2078_v62, %v1172_v23  ;;  %v641_v55 = vmul.f32 %v2082_v37, %v640_v13 }
 0x6f4   :  { %v1163_v57 = vsel %vm1162_vm1, %v2076_v30, %v1159_v51  ;;  %v632_v17 = vmul.f32 0.5, %v631_v12 }
 0x6f5   :  { %v1174_v50 = vadd.f32 %v2078_v62, %v1173_v33  ;;  %v2922_v4 = vsel %vm1165_vm2, %v1167_v60, %v1163_v57  ;;  %v642_v31 = vmul.f32 0.5, %v641_v55  ;;  %vm665_vm2 = vweird.f32 %v588_v15  ;;  %v2150_v55 = vld [vmem:[#allocation6 + $0x58] sm:$0xff] }
 0x6f6   :  { %v633_v21 = vsub.f32 1.5, %v632_v17  ;;  %v1191_v12 = vmul.f32 %v2922_v4, %v2866_v54  ;;  %v2147_v54 = vld [vmem:[#allocation6 + $0x60] sm:$0xff] }
 0x6f7   :  { %v1178_v2 = vsel %vm1177_vm0, %v2078_v62, %v1174_v50  ;;  %v643_v9 = vsub.f32 1.5, %v642_v31  ;;  %v2157_v31 = vld [vmem:[#allocation6 + $0x10] sm:$0xff] }
 0x6f8   :  { %v1183_v25 = vsel %vm1180_vm13, %v1182_v48, %v1178_v2  ;;  %v634_v34 = vmul.f32 %v2080_v10, %v633_v21  ;;  %vm655_vm13 = vweird.f32 %v587_v1  ;;  %v2153_v21 = vld [vmem:[#allocation6 + $0x30] sm:$0xff] }
 0x6f9   :  { %v1186_v45 = vadd.f32 %v1183_v25, %v1183_v25  ;;  %v644_v50 = vmul.f32 %v2082_v37, %v643_v9 }
 0x6fa   :  { %v638_v19 = vsel %vm637_vm7, %v2080_v10, %v634_v34  ;;  %v2158_v34 = vld [vmem:[#allocation6 + $0x18] sm:$0xff] }
 0x6fb   :  { %v1972_v59 = vadd.f32 -1.0, %v1186_v45  ;;  %v673_v46 = vmul.f32 %v638_v19, %v2876_v44  ;;  %v648_v2 = vsel %vm647_vm12, %v2082_v37, %v644_v50 }
 0x6fd   :  { %v2926_v8 = vsel %vm877_vm4, %v1972_v59, %v1183_v25  ;;  %v685_v56 = vmul.f32 %v2711_v42, %v673_v46 }
 0x6fe   :  { %v1192_v27 = vmul.f32 %v2926_v8, %v2922_v4  ;;  %v2148_v4 = vld [vmem:[#allocation6 + $0x68] sm:$0xff] }
 0x6ff   :  { %v560_v28 = vpop.xlane.xlu1 %559  ;;  %v697_v44 = vadd.f32 %v2719_v49, %v685_v56 }
 0x700   :  { %v576_v61 = vmul.f32 %v560_v28, %v2576_v43  ;;  %1194 = vrot.lane.b32.xlu1 %v1192_v27, %s2299_s21 }
 0x701   :  { %v705_v58 = vmax.f32 %v697_v44, 0.0 }
 0x702   :  { %v584_v36 = vadd.f32 1e-05, %v576_v61 }
 0x704   :  { %2083 = vrsqrt.f32 %v584_v36  ;;  %vm625_vm8 = vweird.f32 %v584_v36 }
 0x705   :  { %2085 = vrsqrt.f32 %v587_v1 }
 0x706   :  { %2087 = vrsqrt.f32 %v588_v15 }
 0x70a   :  { %v2084_v38 = vpop.eup %2083 }
 0x70b   :  { %v620_v20 = vmul.f32 %v2084_v38, %v584_v36  ;;  %v2086_v24 = vpop.eup %2085  ;;  %vm626_vm5 = vweird.f32 %v2084_v38 }
 0x70c   :  { %v650_v62 = vmul.f32 %v2086_v24, %v587_v1  ;;  %vm627_vm9 = vmor %vm625_vm8, %vm626_vm5  ;;  %v2088_v40 = vpop.eup %2087  ;;  %vm656_vm0 = vweird.f32 %v2086_v24 }
 0x70d   :  { %v621_v22 = vmul.f32 %v2084_v38, %v620_v20  ;;  %v660_v51 = vmul.f32 %v2088_v40, %v588_v15  ;;  %vm657_vm15 = vmor %vm655_vm13, %vm656_vm0  ;;  %vm666_vm1 = vweird.f32 %v2088_v40  ;;  %v2149_v20 = vld [vmem:[#allocation6 + $0x50] sm:$0xff]  ;;  %v2152_v15 = vld [vmem:[#allocation6 + $0x48] sm:$0xff] }
 0x70e   :  { %v651_v23 = vmul.f32 %v2086_v24, %v650_v62  ;;  %vm667_vm3 = vmor %vm665_vm2, %vm666_vm1  ;;  %v2159_v62 = vld [vmem:[#allocation6] sm:$0xff] }
 0x70f   :  { %v622_v30 = vmul.f32 0.5, %v621_v22  ;;  %v661_v16 = vmul.f32 %v2088_v40, %v660_v51  ;;  %v2154_v22 = vld [vmem:[#allocation6 + $0x38] sm:$0xff] }
 0x710   :  { %v652_v48 = vmul.f32 0.5, %v651_v23 }
 0x711   :  { %v623_v35 = vsub.f32 1.5, %v622_v30  ;;  %v662_v45 = vmul.f32 0.5, %v661_v16  ;;  %v2156_v30 = vld [vmem:[#allocation6 + $0x28] sm:$0xff] }
 0x712   :  { %v653_v25 = vsub.f32 1.5, %v652_v48 }
 0x713   :  { %v624_v43 = vmul.f32 %v2084_v38, %v623_v35  ;;  %v663_v59 = vsub.f32 1.5, %v662_v45  ;;  %v2160_v35 = vld [vmem:[#allocation6 + $0x8] sm:$0xff] }
 0x714   :  { %v654_v57 = vmul.f32 %v2086_v24, %v653_v25 }
 0x715   :  { %v628_v63 = vsel %vm627_vm9, %v2084_v38, %v624_v43  ;;  %v664_v28 = vmul.f32 %v2088_v40, %v663_v59  ;;  %v2146_v38 = vld [vmem:[#allocation6 + $0x78] sm:$0xff] }
 0x716   :  { %v672_v33 = vmul.f32 %v628_v63, %v2911_v26  ;;  %v674_v26 = vmul.f32 %v648_v2, %v2822_v41  ;;  %v658_v3 = vsel %vm657_vm15, %v2086_v24, %v654_v57  ;;  %v2155_v24 = vld [vmem:[#allocation6 + $0x20] sm:$0xff] }
 0x717   :  { %v675_v27 = vmul.f32 %v658_v3, %v2882_v47  ;;  %v668_v61 = vsel %vm667_vm3, %v2088_v40, %v664_v28 }
 0x718   :  { %v684_v39 = vmul.f32 %v2711_v42, %v672_v33  ;;  %v686_v60 = vmul.f32 %v2711_v42, %v674_v26  ;;  %v676_v36 = vmul.f32 %v668_v61, %v2828_v53 }
 0x719   :  { %v687_v29 = vmul.f32 %v2711_v42, %v675_v27 }
 0x71a   :  { %v696_v0 = vadd.f32 %v2719_v49, %v684_v39  ;;  %v698_v10 = vadd.f32 %v2719_v49, %v686_v60  ;;  %v688_v37 = vmul.f32 %v2711_v42, %v676_v36 }
 0x71b   :  { %v699_v32 = vadd.f32 %v2719_v49, %v687_v29 }
 0x71c   :  { %v704_v52 = vmax.f32 %v696_v0, 0.0  ;;  %v706_v41 = vmax.f32 %v698_v10, 0.0  ;;  %v700_v47 = vadd.f32 %v2719_v49, %v688_v37  ;;  %v2145_v49 = vld [vmem:[#allocation6 + $0x70] sm:$0xff] }
 0x71d   :  { %v707_v1 = vmax.f32 %v699_v32, 0.0 }
 0x71e   :  { %1942 = vmatmul.msk.f32.gmra.mxu2 %vm493_vm14, %v704_v52  ;;  %1950 = vmatmul.msk.f32.gmra.mxu3 %vm493_vm14, %v704_v52  ;;  %v708_v11 = vmax.f32 %v700_v47, 0.0 }
 0x726   :  { %1943 = vmatmul.msk.f32.gmra.mxu2 %vm493_vm14, %v705_v58  ;;  %1951 = vmatmul.msk.f32.gmra.mxu3 %vm493_vm14, %v705_v58 }
 0x72e   :  { %1944 = vmatmul.msk.f32.gmra.mxu2 %vm493_vm14, %v706_v41  ;;  %1952 = vmatmul.msk.f32.gmra.mxu3 %vm493_vm14, %v706_v41 }
 0x736   :  { %1945 = vmatmul.msk.f32.gmra.mxu2 %vm493_vm14, %v707_v1  ;;  %1953 = vmatmul.msk.f32.gmra.mxu3 %vm493_vm14, %v707_v1 }
 0x73e   :  { %1946 = vmatmul.msk.f32.gmra.mxu2 %vm493_vm14, %v708_v11  ;;  %1954 = vmatmul.msk.f32.gmra.mxu3 %vm493_vm14, %v708_v11 }
 0x772   :  { %v1195_v13 = vpop.permute.xlu1 %1194 }
 0x773   :  { %v2961_v14 = vadd.f32 %v1195_v13, %v1191_v12 }
 0x775   :  { %2089 = vtanh.f32 %v2961_v14 }
 0x77b   :  { %v2090_v42 = vpop.eup %2089 }
 0x77c   :  { %v1199_v53 = vmul.f32 %v2090_v42, %v2926_v8  ;;  %v2151_v8 = vld [vmem:[#allocation6 + $0x40] sm:$0xff] }
 0x77e   :  { %1203 = vrot.lane.b32.xlu0 %v1199_v53, %s2299_s21 }
 0x7a1   :  { %v781_v43 = vpop.f32.mrf.mxu2  ;;  %v822_v9 = vpop.f32.mrf.mxu3 }
 0x7a2   :  { %v782_v51 = vadd.f32 %v781_v43, %v2780_v6  ;;  %v823_v48 = vadd.f32 %v822_v9, %v2782_v7 }
 0x7a9   :  { %v2968_v19 = vpop.f32.mrf.mxu2  ;;  %v2970_v23 = vpop.f32.mrf.mxu3 }
 0x7b1   :  { %v2972_v63 = vpop.f32.mrf.mxu2  ;;  %v2974_v40 = vpop.f32.mrf.mxu3 }
 0x7b9   :  { %v2976_v33 = vpop.f32.mrf.mxu2  ;;  %v2978_v39 = vpop.f32.mrf.mxu3 }
 0x7c1   :  { %v2980_v46 = vpop.f32.mrf.mxu2  ;;  %v2982_v50 = vpop.f32.mrf.mxu3 }
 0x7f0   :  { %v1204_v17 = vpop.permute.xlu0 %1203 }
 0x7f1   :  { %1973 = vmatmul.msk.f32.vlgmr.msrb.gmra.mxu2 %vm493_vm14, %v1204_v17  ;;  %1974 = vmatmul.msk.f32.vlgmr.msrb.gmra.mxu3 %vm493_vm14, %v1204_v17 }
 0x7f2   :  { %1639 = vmatpush.msrb.mxu2 %v2145_v49  ;;  %1659 = vmatpush.msrb.mxu3 %v2146_v38 }
 0x7f4   :  { %1640 = vmatpush.msrb.mxu2 %v2147_v54  ;;  %1660 = vmatpush.msrb.mxu3 %v2148_v4 }
 0x7f6   :  { %1641 = vmatpush.msrb.mxu2 %v2149_v20  ;;  %1661 = vmatpush.msrb.mxu3 %v2150_v55 }
 0x7f8   :  { %1642 = vmatpush.msrb.mxu2 %v2151_v8  ;;  %1662 = vmatpush.msrb.mxu3 %v2152_v15 }
 0x7fa   :  { %1643 = vmatpush.msrb.mxu2 %v2153_v21  ;;  %1663 = vmatpush.msrb.mxu3 %v2154_v22 }
 0x7fc   :  { %1644 = vmatpush.msrb.mxu2 %v2155_v24  ;;  %1664 = vmatpush.msrb.mxu3 %v2156_v30  ;;  %v785_v30 = vadd.f32 %v2968_v19, %v2780_v6 }
 0x7fe   :  { %1645 = vmatpush.msrb.mxu2 %v2157_v31  ;;  %1665 = vmatpush.msrb.mxu3 %v2158_v34  ;;  %v826_v31 = vadd.f32 %v2970_v23, %v2782_v7 }
 0x800   :  { %1646 = vmatpush.msrb.mxu2 %v2159_v62  ;;  %1666 = vmatpush.msrb.mxu3 %v2160_v35 }
 0x874   :  { %v1224_v0 = vpop.f32.mrf.mxu2  ;;  %v1244_v52 = vpop.f32.mrf.mxu3 }
 0x875   :  { %v1247_v56 = vadd.f32 %v1224_v0, %v782_v51  ;;  %v1248_v2 = vadd.f32 %v1244_v52, %v823_v48 }
 0x877   :  { %v1975_v16 = vmul.f32 -1.442695, %v1247_v56  ;;  %v1250_v25 = vadd.f32 %v1248_v2, %v1248_v2 }
 0x879   :  { %2091 = vpow2.f32 %v1975_v16  ;;  %v1252_v44 = vsel %vm877_vm4, %v1250_v25, %v1248_v2 }
 0x87a   :  { %v1976_v26 = vmul.f32 -1.442695, %v1252_v44 }
 0x87c   :  { %2093 = vpow2.f32 %v1976_v26 }
 0x87f   :  { %v2092_v45 = vpop.eup %2091 }
 0x880   :  { %v1259_v57 = vadd.f32 1.0, %v2092_v45 }
 0x882   :  { %v2094_v58 = vpop.eup %2093  ;;  %2095 = vrcp.f32 %v1259_v57  ;;  %v1272_v11 = vand.u32 2147483648, %v1259_v57  ;;  %vm1266_vm10 = vweird.f32 %v1259_v57  ;;  %v1270_v13 = vand.u32 2147483647, %v1259_v57 }
 0x883   :  { %v1260_v60 = vadd.f32 1.0, %v2094_v58 }
 0x884   :  { %v1273_v49 = vor.u32 1.1754944e-38, %v1272_v11  ;;  %vm1271_vm12 = vcmp.eq.f32.partialorder %v1270_v13, 8.507059e+37 }
 0x885   :  { %2097 = vrcp.f32 %v1260_v60  ;;  %v1287_v61 = vand.u32 2147483648, %v1260_v60  ;;  %v1285_v36 = vand.u32 2147483647, %v1260_v60  ;;  %vm1281_vm6 = vweird.f32 %v1260_v60 }
 0x887   :  { %v1288_v47 = vor.u32 1.1754944e-38, %v1287_v61  ;;  %vm1286_vm9 = vcmp.eq.f32.partialorder %v1285_v36, 8.507059e+37 }
 0x888   :  { %v2096_v59 = vpop.eup %2095 }
 0x889   :  { %v1262_v3 = vmul.f32 %v2096_v59, %v1259_v57  ;;  %vm1267_vm7 = vweird.f32 %v2096_v59 }
 0x88a   :  { %vm1268_vm11 = vmor %vm1266_vm10, %vm1267_vm7 }
 0x88b   :  { %v2098_v10 = vpop.eup %2097  ;;  %v1263_v27 = vsub.f32 1.0, %v1262_v3 }
 0x88c   :  { %v1277_v28 = vmul.f32 %v2098_v10, %v1260_v60  ;;  %vm1282_vm5 = vweird.f32 %v2098_v10 }
 0x88d   :  { %v1264_v29 = vmul.f32 %v2096_v59, %v1263_v27  ;;  %vm1283_vm8 = vmor %vm1281_vm6, %vm1282_vm5 }
 0x88e   :  { %v1278_v41 = vsub.f32 1.0, %v1277_v28 }
 0x88f   :  { %v1265_v37 = vadd.f32 %v2096_v59, %v1264_v29 }
 0x890   :  { %v1279_v32 = vmul.f32 %v2098_v10, %v1278_v41 }
 0x891   :  { %v1269_v17 = vsel %vm1268_vm11, %v2096_v59, %v1265_v37 }
 0x892   :  { %v1280_v1 = vadd.f32 %v2098_v10, %v1279_v32  ;;  %v1274_v54 = vsel %vm1271_vm12, %v1273_v49, %v1269_v17 }
 0x893   :  { %v1297_v55 = vmul.f32 %v1274_v54, %v2961_v14 }
 0x894   :  { %v1284_v12 = vsel %vm1283_vm8, %v2098_v10, %v1280_v1 }
 0x895   :  { %v1289_v42 = vsel %vm1286_vm9, %v1288_v47, %v1284_v12 }
 0x896   :  { %v1292_v53 = vadd.f32 %v1289_v42, %v1289_v42 }
 0x898   :  { %v1978_v38 = vadd.f32 -1.0, %v1292_v53 }
 0x89a   :  { %v1296_v4 = vsel %vm877_vm4, %v1978_v38, %v1289_v42  ;;  %v788_v38 = vadd.f32 %v2972_v63, %v2780_v6 }
 0x89b   :  { %v1298_v20 = vmul.f32 %v1296_v4, %v1274_v54  ;;  %v829_v54 = vadd.f32 %v2974_v40, %v2782_v7 }
 0x89d   :  { %1300 = vrot.lane.b32.xlu2 %v1298_v20, %s2299_s21 }
 0x8f7   :  { %v1301_v8 = vpop.permute.xlu2 %1300 }
 0x8f8   :  { %v1303_v15 = vadd.f32 %v1301_v8, %v1297_v55 }
 0x8fa   :  { %2099 = vtanh.f32 %v1303_v15 }
 0x900   :  { %v2100_v21 = vpop.eup %2099 }
 0x901   :  { %v1305_v22 = vmul.f32 %v2100_v21, %v1296_v4 }
 0x903   :  { %1309 = vrot.lane.b32.xlu1 %v1305_v22, %s2299_s21 }
 0x975   :  { %v1310_v24 = vpop.permute.xlu1 %1309 }
 0x976   :  { %1979 = vmatmul.msk.f32.vlgmr.msra.gmra.mxu0 %vm493_vm14, %v1310_v24  ;;  %1980 = vmatmul.msk.f32.vlgmr.msra.gmra.mxu1 %vm493_vm14, %v1310_v24 }
 0x9f3   :  { %v1330_v34 = vpop.f32.mrf.mxu0  ;;  %v1350_v14 = vpop.f32.mrf.mxu1 }
 0x9f4   :  { %v1353_v62 = vadd.f32 %v1330_v34, %v785_v30  ;;  %v1354_v35 = vadd.f32 %v1350_v14, %v826_v31 }
 0x9f6   :  { %v1981_v43 = vmul.f32 -1.442695, %v1353_v62  ;;  %v1356_v9 = vadd.f32 %v1354_v35, %v1354_v35 }
 0x9f8   :  { %2101 = vpow2.f32 %v1981_v43  ;;  %v1358_v51 = vsel %vm877_vm4, %v1356_v9, %v1354_v35 }
 0x9f9   :  { %v1982_v48 = vmul.f32 -1.442695, %v1358_v51 }
 0x9fb   :  { %2103 = vpow2.f32 %v1982_v48 }
 0x9fe   :  { %v2102_v0 = vpop.eup %2101 }
 0x9ff   :  { %v1365_v52 = vadd.f32 1.0, %v2102_v0 }
 0xa01   :  { %v2104_v56 = vpop.eup %2103  ;;  %2105 = vrcp.f32 %v1365_v52  ;;  %v1378_v27 = vand.u32 2147483648, %v1365_v52  ;;  %vm1372_vm3 = vweird.f32 %v1365_v52  ;;  %v1376_v41 = vand.u32 2147483647, %v1365_v52 }
 0xa02   :  { %v1366_v19 = vadd.f32 1.0, %v2104_v56 }
 0xa03   :  { %v1379_v36 = vor.u32 1.1754944e-38, %v1378_v27  ;;  %vm1377_vm6 = vcmp.eq.f32.partialorder %v1376_v41, 8.507059e+37 }
 0xa04   :  { %2107 = vrcp.f32 %v1366_v19  ;;  %v1393_v57 = vand.u32 2147483648, %v1366_v19  ;;  %v1391_v60 = vand.u32 2147483647, %v1366_v19  ;;  %vm1387_vm13 = vweird.f32 %v1366_v19 }
 0xa06   :  { %v1394_v10 = vor.u32 1.1754944e-38, %v1393_v57  ;;  %vm1392_vm2 = vcmp.eq.f32.partialorder %v1391_v60, 8.507059e+37 }
 0xa07   :  { %v2106_v2 = vpop.eup %2105 }
 0xa08   :  { %v1368_v23 = vmul.f32 %v2106_v2, %v1365_v52  ;;  %vm1373_vm15 = vweird.f32 %v2106_v2 }
 0xa09   :  { %vm1374_vm5 = vmor %vm1372_vm3, %vm1373_vm15 }
 0xa0a   :  { %v2108_v16 = vpop.eup %2107  ;;  %v1369_v25 = vsub.f32 1.0, %v1368_v23 }
 0xa0b   :  { %v1383_v44 = vmul.f32 %v2108_v16, %v1366_v19  ;;  %vm1388_vm0 = vweird.f32 %v2108_v16 }
 0xa0c   :  { %v1370_v45 = vmul.f32 %v2106_v2, %v1369_v25  ;;  %vm1389_vm1 = vmor %vm1387_vm13, %vm1388_vm0 }
 0xa0d   :  { %v1384_v26 = vsub.f32 1.0, %v1383_v44 }
 0xa0e   :  { %v1371_v3 = vadd.f32 %v2106_v2, %v1370_v45 }
 0xa0f   :  { %v1385_v58 = vmul.f32 %v2108_v16, %v1384_v26 }
 0xa10   :  { %v1375_v32 = vsel %vm1374_vm5, %v2106_v2, %v1371_v3 }
 0xa11   :  { %v1386_v59 = vadd.f32 %v2108_v16, %v1385_v58  ;;  %v1380_v37 = vsel %vm1377_vm6, %v1379_v36, %v1375_v32  ;;  %v791_v32 = vadd.f32 %v2976_v33, %v2780_v6  ;;  %v832_v36 = vadd.f32 %v2978_v39, %v2782_v7 }
 0xa12   :  { %v1403_v12 = vmul.f32 %v1380_v37, %v1303_v15 }
 0xa13   :  { %v1390_v28 = vsel %vm1389_vm1, %v2108_v16, %v1386_v59 }
 0xa14   :  { %v1395_v29 = vsel %vm1392_vm2, %v1394_v10, %v1390_v28 }
 0xa15   :  { %v1398_v61 = vadd.f32 %v1395_v29, %v1395_v29 }
 0xa17   :  { %v1984_v1 = vadd.f32 -1.0, %v1398_v61 }
 0xa19   :  { %v1402_v47 = vsel %vm877_vm4, %v1984_v1, %v1395_v29 }
 0xa1a   :  { %v1404_v11 = vmul.f32 %v1402_v47, %v1380_v37 }
 0xa1c   :  { %1406 = vrot.lane.b32.xlu0 %v1404_v11, %s2299_s21 }
 0xa8e   :  { %v1407_v13 = vpop.permute.xlu0 %1406 }
 0xa8f   :  { %v1409_v42 = vadd.f32 %v1407_v13, %v1403_v12 }
 0xa91   :  { %2109 = vtanh.f32 %v1409_v42 }
 0xa97   :  { %v2110_v53 = vpop.eup %2109 }
 0xa98   :  { %v1411_v17 = vmul.f32 %v2110_v53, %v1402_v47 }
 0xa9a   :  { %1415 = vrot.lane.b32.xlu1 %v1411_v17, %s2299_s21 }
 0xb0c   :  { %v1416_v49 = vpop.permute.xlu1 %1415 }
 0xb0d   :  { %1985 = vmatmul.msk.f32.vlgmr.msra.gmra.mxu2 %vm493_vm14, %v1416_v49  ;;  %1986 = vmatmul.msk.f32.vlgmr.msra.gmra.mxu3 %vm493_vm14, %v1416_v49 }
 0xb90   :  { %v1436_v4 = vpop.f32.mrf.mxu2  ;;  %v1456_v20 = vpop.f32.mrf.mxu3 }
 0xb91   :  { %v1459_v55 = vadd.f32 %v1436_v4, %v788_v38  ;;  %v1460_v8 = vadd.f32 %v1456_v20, %v829_v54 }
 0xb93   :  { %v1987_v15 = vmul.f32 -1.442695, %v1459_v55  ;;  %v1462_v21 = vadd.f32 %v1460_v8, %v1460_v8 }
 0xb95   :  { %2111 = vpow2.f32 %v1987_v15  ;;  %v1464_v22 = vsel %vm877_vm4, %v1462_v21, %v1460_v8 }
 0xb96   :  { %v1988_v24 = vmul.f32 -1.442695, %v1464_v22 }
 0xb98   :  { %2113 = vpow2.f32 %v1988_v24 }
 0xb9b   :  { %v2112_v30 = vpop.eup %2111 }
 0xb9c   :  { %v1471_v31 = vadd.f32 1.0, %v2112_v30 }
 0xb9e   :  { %v2114_v34 = vpop.eup %2113  ;;  %2115 = vrcp.f32 %v1471_v31  ;;  %v1484_v23 = vand.u32 2147483648, %v1471_v31  ;;  %vm1478_vm12 = vweird.f32 %v1471_v31  ;;  %v1482_v25 = vand.u32 2147483647, %v1471_v31 }
 0xb9f   :  { %v1472_v63 = vadd.f32 1.0, %v2114_v34 }
 0xba0   :  { %v1485_v57 = vor.u32 1.1754944e-38, %v1484_v23  ;;  %vm1483_vm13 = vcmp.eq.f32.partialorder %v1482_v25, 8.507059e+37 }
 0xba1   :  { %2117 = vrcp.f32 %v1472_v63  ;;  %v1499_v48 = vand.u32 2147483648, %v1472_v63  ;;  %v1497_v52 = vand.u32 2147483647, %v1472_v63  ;;  %vm1493_vm8 = vweird.f32 %v1472_v63 }
 0xba3   :  { %v1500_v2 = vor.u32 1.1754944e-38, %v1499_v48  ;;  %vm1498_vm11 = vcmp.eq.f32.partialorder %v1497_v52, 8.507059e+37 }
 0xba4   :  { %v2116_v14 = vpop.eup %2115 }
 0xba5   :  { %v1474_v40 = vmul.f32 %v2116_v14, %v1471_v31  ;;  %vm1479_vm9 = vweird.f32 %v2116_v14 }
 0xba6   :  { %vm1480_vm0 = vmor %vm1478_vm12, %vm1479_vm9 }
 0xba7   :  { %v2118_v62 = vpop.eup %2117  ;;  %v1475_v35 = vsub.f32 1.0, %v1474_v40 }
 0xba8   :  { %v1489_v43 = vmul.f32 %v2118_v62, %v1472_v63  ;;  %vm1494_vm7 = vweird.f32 %v2118_v62 }
 0xba9   :  { %v1476_v51 = vmul.f32 %v2116_v14, %v1475_v35  ;;  %vm1495_vm10 = vmor %vm1493_vm8, %vm1494_vm7 }
 0xbaa   :  { %v1490_v9 = vsub.f32 1.0, %v1489_v43 }
 0xbab   :  { %v1477_v19 = vadd.f32 %v2116_v14, %v1476_v51 }
 0xbac   :  { %v1491_v0 = vmul.f32 %v2118_v62, %v1490_v9 }
 0xbad   :  { %v1481_v45 = vsel %vm1480_vm0, %v2116_v14, %v1477_v19 }
 0xbae   :  { %v1492_v56 = vadd.f32 %v2118_v62, %v1491_v0  ;;  %v1486_v60 = vsel %vm1483_vm13, %v1485_v57, %v1481_v45 }
 0xbaf   :  { %v1509_v10 = vmul.f32 %v1486_v60, %v1409_v42 }
 0xbb0   :  { %v1496_v16 = vsel %vm1495_vm10, %v2118_v62, %v1492_v56 }
 0xbb1   :  { %v1501_v44 = vsel %vm1498_vm11, %v1500_v2, %v1496_v16 }
 0xbb2   :  { %v1504_v26 = vadd.f32 %v1501_v44, %v1501_v44 }
 0xbb4   :  { %v1990_v58 = vadd.f32 -1.0, %v1504_v26  ;;  %v835_v26 = vadd.f32 %v2982_v50, %v2782_v7 }
 0xbb6   :  { %v1508_v59 = vsel %vm877_vm4, %v1990_v58, %v1501_v44  ;;  %v794_v44 = vadd.f32 %v2980_v46, %v2780_v6 }
 0xbb7   :  { %v1510_v3 = vmul.f32 %v1508_v59, %v1486_v60 }
 0xbb9   :  { %1512 = vrot.lane.b32.xlu2 %v1510_v3, %s2299_s21 }
 0xc13   :  { %v1513_v27 = vpop.permute.xlu2 %1512 }
 0xc14   :  { %v1515_v28 = vadd.f32 %v1513_v27, %v1509_v10 }
 0xc16   :  { %2119 = vtanh.f32 %v1515_v28 }
 0xc1c   :  { %v2120_v41 = vpop.eup %2119 }
 0xc1d   :  { %v1517_v29 = vmul.f32 %v2120_v41, %v1508_v59 }
 0xc1f   :  { %1521 = vrot.lane.b32.xlu0 %v1517_v29, %s2299_s21 }
 0xc91   :  { %v1522_v61 = vpop.permute.xlu0 %1521 }
 0xc92   :  { %1991 = vmatmul.msk.f32.vlgmr.msrb.gmra.mxu0 %vm493_vm14, %v1522_v61  ;;  %1992 = vmatmul.msk.f32.vlgmr.msrb.gmra.mxu1 %vm493_vm14, %v1522_v61 }
 0xd0f   :  { %v1542_v1 = vpop.f32.mrf.mxu0  ;;  %v1562_v37 = vpop.f32.mrf.mxu1 }
 0xd10   :  { %v1565_v47 = vadd.f32 %v1542_v1, %v791_v32  ;;  %v1566_v11 = vadd.f32 %v1562_v37, %v832_v36 }
 0xd12   :  { %v1993_v12 = vmul.f32 -1.442695, %v1565_v47  ;;  %v1568_v13 = vadd.f32 %v1566_v11, %v1566_v11 }
 0xd14   :  { %2121 = vpow2.f32 %v1993_v12  ;;  %v1570_v42 = vsel %vm877_vm4, %v1568_v13, %v1566_v11 }
 0xd15   :  { %v1994_v53 = vmul.f32 -1.442695, %v1570_v42 }
 0xd17   :  { %2123 = vpow2.f32 %v1994_v53 }
 0xd1a   :  { %v2122_v17 = vpop.eup %2121 }
 0xd1b   :  { %v1577_v49 = vadd.f32 1.0, %v2122_v17 }
 0xd1d   :  { %v2124_v38 = vpop.eup %2123  ;;  %2125 = vrcp.f32 %v1577_v49  ;;  %v1590_v63 = vand.u32 2147483648, %v1577_v49  ;;  %vm1584_vm6 = vweird.f32 %v1577_v49  ;;  %v1588_v40 = vand.u32 2147483647, %v1577_v49 }
 0xd1e   :  { %v1578_v33 = vadd.f32 1.0, %v2124_v38 }
 0xd1f   :  { %v1591_v9 = vor.u32 1.1754944e-38, %v1590_v63  ;;  %vm1589_vm8 = vcmp.eq.f32.partialorder %v1588_v40, 8.507059e+37  ;;  %v1739_v63 = vld [vmem:[#allocation8 + $0x48] sm:$0xff]  ;;  %v1734_v40 = vld [vmem:[#allocation8 + $0x20] sm:$0xff] }
 0xd20   :  { %2127 = vrcp.f32 %v1578_v33  ;;  %v1605_v21 = vand.u32 2147483648, %v1578_v33  ;;  %v1603_v24 = vand.u32 2147483647, %v1578_v33  ;;  %vm1599_vm1 = vweird.f32 %v1578_v33 }
 0xd22   :  { %v1606_v34 = vor.u32 1.1754944e-38, %v1605_v21  ;;  %vm1604_vm5 = vcmp.eq.f32.partialorder %v1603_v24, 8.507059e+37  ;;  %v1745_v21 = vld [vmem:[#allocation8 + $0x78] sm:$0xff]  ;;  %v1743_v24 = vld [vmem:[#allocation8 + $0x68] sm:$0xff] }
 0xd23   :  { %v2126_v54 = vpop.eup %2125  ;;  %1785 = vmatpush.msra.mxu1 %v1745_v21 }
 0xd24   :  { %v1580_v39 = vmul.f32 %v2126_v54, %v1577_v49  ;;  %vm1585_vm2 = vweird.f32 %v2126_v54 }
 0xd25   :  { %vm1586_vm7 = vmor %vm1584_vm6, %vm1585_vm2  ;;  %1786 = vmatpush.msra.mxu1 %v1743_v24  ;;  %vm1875_vm2 = vcmp.ge.s32.totalorder %v2778_v5, 77 }
 0xd26   :  { %v2128_v4 = vpop.eup %2127  ;;  %v1581_v20 = vsub.f32 1.0, %v1580_v39 }
 0xd27   :  { %v1595_v55 = vmul.f32 %v2128_v4, %v1578_v33  ;;  %vm1600_vm15 = vweird.f32 %v2128_v4 }
 0xd28   :  { %v1582_v15 = vmul.f32 %v2126_v54, %v1581_v20  ;;  %vm1601_vm3 = vmor %vm1599_vm1, %vm1600_vm15 }
 0xd29   :  { %v1596_v8 = vsub.f32 1.0, %v1595_v55 }
 0xd2a   :  { %v1583_v31 = vadd.f32 %v2126_v54, %v1582_v15  ;;  %v1744_v15 = vld [vmem:[#allocation8 + $0x70] sm:$0xff] }
 0xd2b   :  { %v1597_v22 = vmul.f32 %v2128_v4, %v1596_v8  ;;  %1765 = vmatpush.msra.mxu0 %v1744_v15  ;;  %v2024_v15 = vld [vmem:[%s3076_s17] ss:$0 sm:$0xff] }
 0xd2c   :  { %v1587_v43 = vsel %vm1586_vm7, %v2126_v54, %v1583_v31  ;;  %v1741_v31 = vld [vmem:[#allocation8 + $0x58] sm:$0xff] }
 0xd2d   :  { %v1598_v30 = vadd.f32 %v2128_v4, %v1597_v22  ;;  %v1592_v48 = vsel %vm1589_vm8, %v1591_v9, %v1587_v43  ;;  %v1742_v22 = vld [vmem:[#allocation8 + $0x60] sm:$0xff]  ;;  %1787 = vmatpush.msra.mxu1 %v1741_v31  ;;  %v1733_v43 = vld [vmem:[#allocation8 + $0x18] sm:$0xff] }
 0xd2e   :  { %v1615_v56 = vmul.f32 %v1592_v48, %v1515_v28  ;;  %1766 = vmatpush.msra.mxu0 %v1742_v22  ;;  %v1730_v9 = vld [vmem:[#allocation8] sm:$0xff] }
 0xd2f   :  { %v1602_v14 = vsel %vm1601_vm3, %v2128_v4, %v1598_v30  ;;  %v1740_v30 = vld [vmem:[#allocation8 + $0x50] sm:$0xff]  ;;  %1788 = vmatpush.msra.mxu1 %v1739_v63  ;;  %vm1876_vm3 = vcmp.lt.s32.totalorder %v2778_v5, 81 }
 0xd30   :  { %v1607_v62 = vsel %vm1604_vm5, %v1606_v34, %v1602_v14  ;;  %v1738_v34 = vld [vmem:[#allocation8 + $0x40] sm:$0xff]  ;;  %1767 = vmatpush.msra.mxu0 %v1740_v30  ;;  %v1736_v14 = vld [vmem:[#allocation8 + $0x30] sm:$0xff]  ;;  %vm1877_vm8 = vmand %vm1875_vm2, %vm1876_vm3 }
 0xd31   :  { %v1610_v35 = vadd.f32 %v1607_v62, %v1607_v62  ;;  %1789 = vmatpush.msra.mxu1 %v1737_v18 }
 0xd32   :  { %1768 = vmatpush.msra.mxu0 %v1738_v34 }
 0xd33   :  { %v1996_v51 = vadd.f32 -1.0, %v1610_v35  ;;  %v1732_v35 = vld [vmem:[#allocation8 + $0x10] sm:$0xff] }
 0xd34   :  { %1769 = vmatpush.msra.mxu0 %v1736_v14 }
 0xd35   :  { %v1614_v0 = vsel %vm877_vm4, %v1996_v51, %v1607_v62  ;;  %v1735_v62 = vld [vmem:[#allocation8 + $0x28] sm:$0xff] }
 0xd36   :  { %v1616_v52 = vmul.f32 %v1614_v0, %v1592_v48  ;;  %1770 = vmatpush.msra.mxu0 %v1734_v40  ;;  %1790 = vmatpush.msra.mxu1 %v1735_v62  ;;  %v1731_v51 = vld [vmem:[#allocation8 + $0x8] sm:$0xff] }
 0xd38   :  { %1618 = vrot.lane.b32.xlu1 %v1616_v52, %s2299_s21  ;;  %1771 = vmatpush.msra.mxu0 %v1732_v35 }
 0xd39   :  { %1791 = vmatpush.msra.mxu1 %v1733_v43 }
 0xd3a   :  { %1772 = vmatpush.msra.mxu0 %v1730_v9 }
 0xd3b   :  { %1792 = vmatpush.msra.mxu1 %v1731_v51 }
 0xdaa   :  { %v1619_v19 = vpop.permute.xlu1 %1618 }
 0xdab   :  { %v3028_v2 = vadd.f32 %v1619_v19, %v1615_v56 }
 0xdad   :  { %2129 = vtanh.f32 %v3028_v2 }
 0xdb3   :  { %v2130_v23 = vpop.eup %2129 }
 0xdb4   :  { %v1623_v16 = vmul.f32 %v2130_v23, %v1614_v0  ;;  %v1814_v23 = vld [vmem:[#allocation9 + $0x78] sm:$0xff] }
 0xdb5   :  { %1835 = vmatpush.msra.mxu2 %v1814_v23 }
 0xdb6   :  { %1627 = vrot.lane.b32.xlu2 %v1623_v16, %s2299_s21  ;;  %v1830_v16 = vld [vmem:[#allocation9 + $0xf8] sm:$0xff] }
 0xdb7   :  { %1855 = vmatpush.msra.mxu3 %v1830_v16 }
 0xe10   :  { %v1628_v25 = vpop.permute.xlu2 %1627 }
 0xe11   :  { %1997 = vmatmul.msk.f32.vlgmr.msrb.gmra.mxu2 %vm493_vm14, %v1628_v25  ;;  %1998 = vmatmul.msk.f32.vlgmr.msrb.gmra.mxu3 %vm493_vm14, %v1628_v25  ;;  %v1813_v25 = vld [vmem:[#allocation9 + $0x70] sm:$0xff] }
 0xe12   :  { %1836 = vmatpush.msra.mxu2 %v1813_v25 }
 0xe94   :  { %v1648_v45 = vpop.f32.mrf.mxu2  ;;  %v1668_v57 = vpop.f32.mrf.mxu3 }
 0xe95   :  { %v1671_v58 = vadd.f32 %v1648_v45, %v794_v44  ;;  %v1672_v60 = vadd.f32 %v1668_v57, %v835_v26  ;;  %v1829_v44 = vld [vmem:[#allocation9 + $0xf0] sm:$0xff]  ;;  %v1812_v26 = vld [vmem:[#allocation9 + $0x68] sm:$0xff]  ;;  %v1811_v57 = vld [vmem:[#allocation9 + $0x60] sm:$0xff] }
 0xe96   :  { %v1828_v45 = vld [vmem:[#allocation9 + $0xe8] sm:$0xff]  ;;  %1856 = vmatpush.msra.mxu3 %v1829_v44  ;;  %1837 = vmatpush.msra.mxu2 %v1812_v26 }
 0xe97   :  { %v1999_v59 = vmul.f32 -1.442695, %v1671_v58  ;;  %v1674_v3 = vadd.f32 %v1672_v60, %v1672_v60  ;;  %v1827_v58 = vld [vmem:[#allocation9 + $0xe0] sm:$0xff] }
 0xe98   :  { %1857 = vmatpush.msra.mxu3 %v1828_v45  ;;  %1838 = vmatpush.msra.mxu2 %v1811_v57 }
 0xe99   :  { %2131 = vpow2.f32 %v1999_v59  ;;  %v1676_v10 = vsel %vm877_vm4, %v1674_v3, %v1672_v60  ;;  %v1826_v60 = vld [vmem:[#allocation9 + $0xd8] sm:$0xff]  ;;  %v1809_v59 = vld [vmem:[#allocation9 + $0x50] sm:$0xff] }
 0xe9a   :  { %v2000_v27 = vmul.f32 -1.442695, %v1676_v10  ;;  %1858 = vmatpush.msra.mxu3 %v1827_v58  ;;  %v1825_v3 = vld [vmem:[#allocation9 + $0xd0] sm:$0xff]  ;;  %v1808_v10 = vld [vmem:[#allocation9 + $0x48] sm:$0xff] }
 0xe9c   :  { %2133 = vpow2.f32 %v2000_v27  ;;  %1859 = vmatpush.msra.mxu3 %v1826_v60  ;;  %v1824_v27 = vld [vmem:[#allocation9 + $0xc8] sm:$0xff] }
 0xe9e   :  { %1860 = vmatpush.msra.mxu3 %v1825_v3 }
 0xe9f   :  { %v2132_v28 = vpop.eup %2131 }
 0xea0   :  { %v1683_v41 = vadd.f32 1.0, %v2132_v28  ;;  %v1807_v28 = vld [vmem:[#allocation9 + $0x40] sm:$0xff]  ;;  %1861 = vmatpush.msra.mxu3 %v1824_v27 }
 0xea2   :  { %v2134_v29 = vpop.eup %2133  ;;  %2135 = vrcp.f32 %v1683_v41  ;;  %v1696_v53 = vand.u32 2147483648, %v1683_v41  ;;  %vm1690_vm13 = vweird.f32 %v1683_v41  ;;  %v1694_v49 = vand.u32 2147483647, %v1683_v41 }
 0xea3   :  { %v1684_v6 = vadd.f32 1.0, %v2134_v29  ;;  %v1806_v29 = vld [vmem:[#allocation9 + $0x38] sm:$0xff] }
 0xea4   :  { %v1697_v39 = vor.u32 1.1754944e-38, %v1696_v53  ;;  %vm1695_vm1 = vcmp.eq.f32.partialorder %v1694_v49, 8.507059e+37  ;;  %v1799_v53 = vld [vmem:[#allocation9] sm:$0xff] }
 0xea5   :  { %2137 = vrcp.f32 %v1684_v6  ;;  %v1711_v37 = vand.u32 2147483648, %v1684_v6  ;;  %v1709_v11 = vand.u32 2147483647, %v1684_v6  ;;  %vm1705_vm10 = vweird.f32 %v1684_v6  ;;  %v1746_v49 = vld [vmem:[%s3074_s15] sm:$0x3]  ;;  %s2300_s15 = smov [#allocation11]  }
 0xea6   :  { %s1909_s17 = sshll.u32 %s2300_s15, 4  ;;  %s1910_s17 = int_to_ptr.vmem [resolvable:$true] %s1909_s17 }
 0xea7   :  { %v1712_v42 = vor.u32 1.1754944e-38, %v1711_v37  ;;  %vm1710_vm0 = vcmp.eq.f32.partialorder %v1709_v11, 8.507059e+37  ;;  %v1818_v37 = vld [vmem:[#allocation9 + $0x98] sm:$0xff]  ;;  %v1801_v11 = vld [vmem:[#allocation9 + $0x10] sm:$0xff] }
 0xea8   :  { %v2136_v46 = vpop.eup %2135 }
 0xea9   :  { %v1686_v7 = vmul.f32 %v2136_v46, %v1683_v41  ;;  %vm1691_vm11 = vweird.f32 %v2136_v46  ;;  %v1823_v41 = vld [vmem:[#allocation9 + $0xc0] sm:$0xff] }
 0xeaa   :  { %vm1692_vm15 = vmor %vm1690_vm13, %vm1691_vm11  ;;  %1862 = vmatpush.msra.mxu3 %v1823_v41 }
 0xeab   :  { %v2138_v50 = vpop.eup %2137  ;;  %v1687_v61 = vsub.f32 1.0, %v1686_v7  ;;  %v1821_v7 = vld [vmem:[#allocation9 + $0xb0] sm:$0xff] }
 0xeac   :  { %v1701_v32 = vmul.f32 %v2138_v50, %v1684_v6  ;;  %vm1706_vm9 = vweird.f32 %v2138_v50  ;;  %v1822_v6 = vld [vmem:[#allocation9 + $0xb8] sm:$0xff] }
 0xead   :  { %v1688_v1 = vmul.f32 %v2136_v46, %v1687_v61  ;;  %vm1707_vm12 = vmor %vm1705_vm10, %vm1706_vm9  ;;  %1863 = vmatpush.msra.mxu3 %v1822_v6  ;;  %v1820_v61 = vld [vmem:[#allocation9 + $0xa8] sm:$0xff] }
 0xeae   :  { %v1702_v36 = vsub.f32 1.0, %v1701_v32  ;;  %v1803_v32 = vld [vmem:[#allocation9 + $0x20] sm:$0xff] }
 0xeaf   :  { %v1689_v13 = vadd.f32 %v2136_v46, %v1688_v1  ;;  %1864 = vmatpush.msra.mxu3 %v1821_v7  ;;  %v1802_v1 = vld [vmem:[#allocation9 + $0x18] sm:$0xff] }
 0xeb0   :  { %v1703_v47 = vmul.f32 %v2138_v50, %v1702_v36  ;;  %v1819_v36 = vld [vmem:[#allocation9 + $0xa0] sm:$0xff] }
 0xeb1   :  { %v1693_v54 = vsel %vm1692_vm15, %v2136_v46, %v1689_v13  ;;  %v1805_v46 = vld [vmem:[#allocation9 + $0x30] sm:$0xff]  ;;  %1865 = vmatpush.msra.mxu3 %v1820_v61  ;;  %v1800_v13 = vld [vmem:[#allocation9 + $0x8] sm:$0xff] }
 0xeb2   :  { %v1704_v12 = vadd.f32 %v2138_v50, %v1703_v47  ;;  %v1698_v20 = vsel %vm1695_vm1, %v1697_v39, %v1693_v54 }
 0xeb3   :  { %v1721_v48 = vmul.f32 %v1698_v20, %v3028_v2  ;;  %v1810_v2 = vld [vmem:[#allocation9 + $0x58] sm:$0xff]  ;;  %1866 = vmatpush.msra.mxu3 %v1819_v36 }
 0xeb4   :  { %v1708_v17 = vsel %vm1707_vm12, %v2138_v50, %v1704_v12  ;;  %1839 = vmatpush.msra.mxu2 %v1810_v2  ;;  %v1804_v50 = vld [vmem:[#allocation9 + $0x28] sm:$0xff]  ;;  %v1817_v12 = vld [vmem:[#allocation9 + $0x90] sm:$0xff] }
 0xeb5   :  { %v1713_v38 = vsel %vm1710_vm0, %v1712_v42, %v1708_v17  ;;  %1867 = vmatpush.msra.mxu3 %v1818_v37  ;;  %v1816_v42 = vld [vmem:[#allocation9 + $0x88] sm:$0xff]  ;;  %v1815_v17 = vld [vmem:[#allocation9 + $0x80] sm:$0xff] }
 0xeb6   :  { %v1716_v33 = vadd.f32 %v1713_v38, %v1713_v38  ;;  %1840 = vmatpush.msra.mxu2 %v1809_v59 }
 0xeb7   :  { %1868 = vmatpush.msra.mxu3 %v1817_v12 }
 0xeb8   :  { %v2002_v4 = vadd.f32 -1.0, %v1716_v33  ;;  %1841 = vmatpush.msra.mxu2 %v1808_v10  ;;  %v1749_v33 = vperm.slane %v1746_v49, 1 }
 0xeb9   :  { %1869 = vmatpush.msra.mxu3 %v1816_v42 }
 0xeba   :  { %v1720_v55 = vsel %vm877_vm4, %v2002_v4, %v1713_v38  ;;  %1842 = vmatpush.msra.mxu2 %v1807_v28  ;;  %vm1902_vm4 = vcmask 1048064   ;;  %v1748_v38 = vperm.slane %v1746_v49, 0 }
 0xebb   :  { %v1722_v8 = vmul.f32 %v1720_v55, %v1698_v20  ;;  %1870 = vmatpush.msra.mxu3 %v1815_v17 }
 0xebc   :  { %1843 = vmatpush.msra.mxu2 %v1806_v29 }
 0xebd   :  { %1724 = vrot.lane.b32.xlu0 %v1722_v8, %s2299_s21 }
 0xebe   :  { %1844 = vmatpush.msra.mxu2 %v1805_v46 }
 0xec0   :  { %1845 = vmatpush.msra.mxu2 %v1804_v50 }
 0xec2   :  { %1846 = vmatpush.msra.mxu2 %v1803_v32 }
 0xec4   :  { %1847 = vmatpush.msra.mxu2 %v1802_v1 }
 0xec6   :  { %1848 = vmatpush.msra.mxu2 %v1801_v11 }
 0xec8   :  { %1849 = vmatpush.msra.mxu2 %v1800_v13 }
 0xeca   :  { %1850 = vmatpush.msra.mxu2 %v1799_v53 }
 0xf2f   :  { %v1725_v0 = vpop.permute.xlu0 %1724 }
 0xf30   :  { %v1727_v52 = vadd.f32 %v1725_v0, %v1721_v48 }
 0xf32   :  { %2139 = vtanh.f32 %v1727_v52 }
 0xf38   :  { %v2140_v56 = vpop.eup %2139 }
 0xf39   :  { %v1729_v19 = vmul.f32 %v2140_v56, %v1720_v55 }
 0xf3b   :  { %1753 = vrot.lane.b32.xlu1 %v1729_v19, %s2299_s21 }
 0xfad   :  { %v1754_v47 = vpop.permute.xlu1 %1753 }
 0xfae   :  { %1901 = vst.msk [vmem:[#allocation11 + $0x8] sm:$0xff] %vm493_vm14, %v1754_v47  ;;  %2003 = vmatmul.msk.f32.vlgmr.msra.gmra.mxu0 %vm493_vm14, %v1754_v47  ;;  %2004 = vmatmul.msk.f32.vlgmr.msra.gmra.mxu1 %vm493_vm14, %v1754_v47 }
 0xfaf   :  { %1903 = vst.msk [vmem:[#allocation11 + $0x8] sm:$0xff] %vm1902_vm4, %v1727_v52 }
0x102b   :  { %v1774_v54 = vpop.f32.mrf.mxu0  ;;  %v1794_v39 = vpop.f32.mrf.mxu1 }
0x102c   :  { %v1775_v4 = vadd.f32 %v1774_v54, %v1748_v38  ;;  %v1795_v20 = vadd.f32 %v1794_v39, %v1749_v33 }
0x102e   :  { %v1797_v55 = vmax.f32 %v1775_v4, 0.0  ;;  %v1798_v8 = vmax.f32 %v1795_v20, 0.0 }
0x1030   :  { %1851 = vmatmul.f32.vlgmr.msra.gmra.mxu2 %v1797_v55  ;;  %1871 = vmatmul.f32.vlgmr.msra.gmra.mxu3 %v1798_v8 }
0x10b3   :  { %v1852_v21 = vpop.f32.mrf.mxu2  ;;  %v1872_v24 = vpop.f32.mrf.mxu3 }
0x10b4   :  { %v1853_v22 = vadd.f32 %v2024_v15, %v1852_v21 }
0x10b6   :  { %v1873_v30 = vadd.f32 %v1872_v24, %v1853_v22 }
0x10b8   :  { %v2005_v31 = vmul.f32 -1.442695, %v1873_v30 }
0x10ba   :  { %2141 = vpow2.f32 %v2005_v31 }
0x10c0   :  { %v2142_v34 = vpop.eup %2141 }
0x10c1   :  { %v1881_v63 = vadd.f32 1.0, %v2142_v34 }
0x10c3   :  { %2143 = vrcp.f32 %v1881_v63  ;;  %v1893_v62 = vand.u32 2147483648, %v1881_v63  ;;  %v1891_v43 = vand.u32 2147483647, %v1881_v63  ;;  %vm1887_vm5 = vweird.f32 %v1881_v63 }
0x10c5   :  { %v1894_v51 = vor.u32 1.1754944e-38, %v1893_v62  ;;  %vm1892_vm7 = vcmp.eq.f32.partialorder %v1891_v43, 8.507059e+37 }
0x10c9   :  { %v2144_v14 = vpop.eup %2143 }
0x10ca   :  { %v1883_v18 = vmul.f32 %v2144_v14, %v1881_v63  ;;  %vm1888_vm14 = vweird.f32 %v2144_v14 }
0x10cb   :  { %vm1889_vm6 = vmor %vm1887_vm5, %vm1888_vm14 }
0x10cc   :  { %v1884_v40 = vsub.f32 1.0, %v1883_v18 }
0x10ce   :  { %v1885_v35 = vmul.f32 %v2144_v14, %v1884_v40 }
0x10d0   :  { %v1886_v9 = vadd.f32 %v2144_v14, %v1885_v35 }
0x10d2   :  { %v1890_v48 = vsel %vm1889_vm6, %v2144_v14, %v1886_v9 }
0x10d3   :  { %v1895_v0 = vsel %vm1892_vm7, %v1894_v51, %v1890_v48 }
0x10d4   :  { %v1897_v52 = vmul.f32 8.0, %v1895_v0 }
0x10d6   :  { %v1898_v56 = vsel %vm1877_vm8, %v1897_v52, %v1873_v30 }
0x10d7   :  { %1899 = vst [vmem:[#allocation11] sm:$0xff] %v1898_v56 }
0x10d8   :  { %1914 = dma.vmem_to_hbm [thread:$0]  %s1910_s17, 256, %s1912_s27, [#allocation5]  }
0x10d9   :  { %2287 = dma.done.wait [#allocation5], 256  }
0x10da   :  { %2288 = vsyncadd [#allocation5], 4294967040 }
0x10db   :  { %1919 = vsyncpa [#allocation4], 1 }
0x10dc   :  { %1920 = vsyncpa [#allocation7], 1 }
0x10dd   :  { %1921 = vsyncpa [#allocation10], 1 }
0x10de   :  { %1922 = vsyncpa [#allocation5], 1 }

</bundles_post_ra>
